<compile_context>
chip_gen: v7x
topology: tpu7x:2x2x1
jax: 0.10.0
libtpu: 0.0.40
codegen_flags: <defaults>
</compile_context>

<pallas_src>
import numpy as np
import jax
import jax.numpy as jnp
from jax import lax
from jax.experimental import pallas as pl
from jax.experimental.pallas import tpu as pltpu

VERY_NEG_NUMBER = -100000000000.0
VERY_SMALL_NUMBER = 1e-10

# ---------------- synthetic config (small shapes) ----------------
BATCH = 2
MAX_LOCAL_ENTITY = 16
MAX_FACT = 24
MAX_QUERY_WORD = 8
ENTITY_DIM = 32
WORD_DIM = 32            # == ENTITY_DIM -> entity_linear skipped (matches torch branch)
NUM_LAYER = 2
NUM_ENTITY = 50
NUM_RELATION = 10
NUM_WORD = 40
PAGERANK_LAMBDA = 0.8
FACT_SCALE = 3.0
K = 3                    # 2 + (use_kb or use_doc)
OUT_LANES = 128          # lane-dense score slab (>= BATCH * MAX_LOCAL_ENTITY)


# ---------------- Pallas kernel: whole-batch GraftNet propagation ----------------
def graftnet_kernel(qhid_ref, attmask_ref, qnode_ref, relemb_ref,
                    e2f_ref, f2e_ref, selE_ref, selF_ref, ent_ref, pr_ref,
                    w_rel_ref, b_rel_ref,
                    w_q2e_ref, b_q2e_ref,
                    w_self_ref, b_self_ref,
                    w_head_ref, b_head_ref,
                    w_tail_ref, b_tail_ref,
                    w_e2q_ref, b_e2q_ref,
                    w_e2e_ref, b_e2e_ref,
                    w_score_ref, b_score_ref,
                    score_ref):
    D = ENTITY_DIM
    BE = BATCH * MAX_LOCAL_ENTITY
    BF = BATCH * MAX_FACT
    inv_div = jnp.float32(1.0 / np.sqrt(D))

    def bf(x):
        # hoist-friendly cast helper: no-op if already bf16
        return x if x.dtype == jnp.bfloat16 else x.astype(jnp.bfloat16)

    def dgf(a, b, ca, cb):
        # f32 MXU matmul (attention logits / pagerank path), f32 accumulation
        return lax.dot_general(a, b, (((ca,), (cb,)), ((), ())),
                               preferred_element_type=jnp.float32)

    def dgb(a, b, ca, cb):
        # bf16 MXU matmul, f32 accumulation
        return lax.dot_general(bf(a), bf(b), (((ca,), (cb,)), ((), ())),
                               preferred_element_type=jnp.float32)

    # ---- hoisted loads / casts shared across layers ----
    e2f_f32 = e2f_ref[...]            # (BF, BE) block-diag
    f2e_f32 = f2e_ref[...]            # (BE, BF) block-diag
    e2f_bf = bf(e2f_f32)
    f2e_bf = bf(f2e_f32)
    selE_f32 = selE_ref[...]          # (BE, B) one-hot entity-row -> batch
    selE_bf = bf(selE_f32)
    selF = selF_ref[...]              # (BF, B) one-hot fact-row -> batch

    ent_all = ent_ref[...]            # (BE, D) f32
    pr_all = pr_ref[...]              # (BE, 1) f32
    qnode_all = qnode_ref[...]        # (B, D)  f32

    # ---- relation_linear over all B*F fact rows (one matmul; relemb already bf16) ----
    local_fact = dgb(relemb_ref[...], w_rel_ref[...], 1, 0) + b_rel_ref[...]   # (BF, D)
    local_fact_bf = bf(local_fact)

    # ---- batched fact <-> query attention (f32 logits; 1/sqrt(D) folded once) ----
    qhid = qhid_ref[...] * inv_div                              # (BQ, D)
    sim = dgf(qhid, local_fact, 1, 1) + attmask_ref[...]        # (BQ, BF), cross-batch masked
    sim = jnp.exp(sim - jnp.max(sim, axis=0, keepdims=True))
    denom = jnp.maximum(jnp.sum(sim, axis=0, keepdims=True), VERY_SMALL_NUMBER)
    sim = sim * pl.reciprocal(denom, approx=True)               # softmax over query words
    att = dgf(sim, qhid, 0, 0)                                  # (BF, D) == sim^T @ qhid
    W = jnp.sum(att * local_fact, axis=1, keepdims=True)        # (BF, 1)

    # per-batch max of W via the one-hot fact->batch selector (segment max, no loops)
    W_seg = jnp.where(selF > 0.0, W, VERY_NEG_NUMBER)           # (BF, B)
    W_max = jnp.max(W_seg, axis=0, keepdims=True)               # (1, B)
    w_tilde = jnp.exp(W - jnp.sum(selF * W_max, axis=1, keepdims=True))      # (BF, 1)

    # e2f_softmax = e2f^T @ W_tilde, clamped; exact f32, reused every layer
    e2f_softmax = jnp.maximum(dgf(e2f_f32, w_tilde, 0, 0), VERY_SMALL_NUMBER)  # (BE, 1)

    # ---- GNN layers (unrolled; static indices into stacked per-layer weights) ----
    for i in range(NUM_LAYER):
        w_q2e = w_q2e_ref[i]; b_q2e = b_q2e_ref[i]
        w_self = w_self_ref[i]; b_self = b_self_ref[i]
        w_head = w_head_ref[i]; b_head = b_head_ref[i]
        w_tail = w_tail_ref[i]; b_tail = b_tail_ref[i]
        w_e2q = w_e2q_ref[i]; b_e2q = b_e2q_ref[i]
        w_e2e = w_e2e_ref[i]; b_e2e = b_e2e_ref[i]

        ent_bf = bf(ent_all)                                    # hoisted: reused twice below

        head_all = dgb(ent_bf, w_head, 1, 0) + b_head           # (BE, D)
        self_ent = dgb(ent_bf, w_self, 1, 0) + b_self           # (BE, D)
        self_fact = dgb(local_fact_bf, w_self, 1, 0) + b_self   # (BF, D)

        # entity -> fact propagation: one block-diag matmul over the whole batch
        e2f_emb = jnp.maximum(self_fact + dgb(e2f_bf, head_all, 1, 0), 0.0)   # (BF, D)
        e2f_sn = w_tilde * dgf(e2f_f32, pr_all / e2f_softmax, 1, 0)           # (BF, 1), exact div
        e2f_emb = e2f_emb * e2f_sn

        # fact -> entity propagation: one block-diag matmul
        tail_all = dgb(e2f_emb, w_tail, 1, 0) + b_tail                        # (BF, D)
        f2e_emb = jnp.maximum(self_ent + dgb(f2e_bf, tail_all, 1, 0), 0.0)    # (BE, D)
        pr_all = (PAGERANK_LAMBDA * dgf(f2e_f32, e2f_sn, 1, 0)
                  + (1.0 - PAGERANK_LAMBDA) * pr_all)                         # (BE, 1)

        # q2e_linear(query_node_emb): one (B,D)x(D,D) matmul, expanded to all entity
        # rows with a one-hot selector matmul (no broadcast_to / per-example concat)
        q2e_all = dgb(qnode_all, w_q2e, 1, 0) + b_q2e                         # (B, D)
        q2e_exp = dgb(selE_bf, q2e_all, 1, 0)                                 # (BE, D)

        # fused K=3D concat linears; FACT_SCALE folded into w[2D:3D, :] at trace time
        nxt = bf(jnp.concatenate([ent_all, q2e_exp, f2e_emb], axis=1))        # (BE, 3D) bf16
        new_ent = jnp.maximum(dgb(nxt, w_e2e, 1, 0) + b_e2e, 0.0)             # (BE, D)
        if i < NUM_LAYER - 1:
            # query-node update only feeds the next layer -> skipped on the last one
            e2q_all = dgb(nxt, w_e2q, 1, 0) + b_e2q                           # (BE, D)
            # per-batch pr-weighted sum of e2q rows, as one dot_general
            qnode_all = dgf(selE_f32 * pr_all, e2q_all, 0, 0)                 # (B, D)
        ent_all = new_ent

    # ---- final score, emitted as one lane-dense (1, OUT_LANES) row ----
    sc = dgb(w_score_ref[...], ent_all, 1, 1) + b_score_ref[...]              # (1, BE)
    score_ref[...] = jnp.concatenate(
        [sc, jnp.zeros((1, OUT_LANES - BE), jnp.float32)], axis=1)


# ---------------- glue: LSTM query encoder (plain JAX) ----------------
# TODO(synk): the sequential LSTM recurrence (8 tiny (B,32)x(32,128) gate matmuls)
# has no clean Pallas tiling win at these shapes; it stays in plain JAX (lax.scan).
# Folding it into the same pallas_call would remove ~8 tiny HLO ops if it shows up
# as dispatch overhead in an end-to-end profile.
def lstm_forward(x, w_ih, w_hh, b_ih, b_hh, hidden_size):
    B = x.shape[0]
    h0 = jnp.zeros((B, hidden_size), jnp.float32)
    c0 = jnp.zeros((B, hidden_size), jnp.float32)

    def step(carry, xt):
        h, c = carry
        gates = xt @ w_ih.T + b_ih + h @ w_hh.T + b_hh
        i, f, g, o = jnp.split(gates, 4, axis=1)
        i = jax.nn.sigmoid(i)
        f = jax.nn.sigmoid(f)
        g = jnp.tanh(g)
        o = jax.nn.sigmoid(o)
        c = f * c + i * g
        h = o * jnp.tanh(c)
        return (h, c), h

    (hT, _), hs = lax.scan(step, (h0, c0), jnp.swapaxes(x, 0, 1))
    return jnp.swapaxes(hs, 0, 1), hT          # (B, Q, H), (B, H)


# ---------------- pallas_call wrapper ----------------
def run_gnn_kernel(qhid, qmask, qnode, relemb, e2f_mat, f2e_mat, ent_emb, pagerank, params):
    B, Q, D = qhid.shape
    E = ent_emb.shape[1]
    F = relemb.shape[1]
    bf16 = lambda a: a.astype(jnp.bfloat16)

    # fold FACT_SCALE into the f2e block of the concat weights (block-matmul identity)
    w_e2q = params["w_e2q"].at[:, 2 * D:, :].multiply(FACT_SCALE)
    w_e2e = params["w_e2e"].at[:, 2 * D:, :].multiply(FACT_SCALE)

    # block-diagonal adjacencies: each propagation stage becomes ONE in-kernel matmul
    eyeB = jnp.eye(B, dtype=jnp.float32)
    e2f_bd = jnp.einsum('bfe,bc->bfce', e2f_mat, eyeB).reshape(B * F, B * E)
    f2e_bd = jnp.einsum('bef,bc->becf', f2e_mat, eyeB).reshape(B * E, B * F)

    # static one-hot row->batch selectors
    selE = jnp.asarray(np.kron(np.eye(B, dtype=np.float32), np.ones((E, 1), np.float32)))
    selF = jnp.asarray(np.kron(np.eye(B, dtype=np.float32), np.ones((F, 1), np.float32)))

    # additive attention mask: 0 where (same batch block AND valid query word), VERY_NEG else
    blk = jnp.asarray(np.kron(np.eye(B, dtype=np.float32), np.ones((Q, F), np.float32)))
    att_mask = (1.0 - qmask.reshape(B * Q, 1) * blk) * VERY_NEG_NUMBER       # (B*Q, B*F)

    batch_inputs = [
        qhid.reshape(B * Q, D),                        # (B*Q, D)
        att_mask,                                      # (B*Q, B*F)
        qnode.reshape(B, D),                           # (B, D)
        bf16(relemb.reshape(B * F, relemb.shape[2])),  # (B*F, 2*word_dim)
        e2f_bd, f2e_bd, selE, selF,
        ent_emb.reshape(B * E, D),                     # (B*E, D)
        pagerank.reshape(B * E, 1),                    # (B*E, 1)
    ]
    weight_inputs = [
        bf16(params["w_rel"]), params["b_rel"],
        bf16(params["w_q2e"]), params["b_q2e"],
        bf16(params["w_self"]), params["b_self"],
        bf16(params["w_head"]), params["b_head"],
        bf16(params["w_tail"]), params["b_tail"],
        bf16(w_e2q), params["b_e2q"],
        bf16(w_e2e), params["b_e2e"],
        bf16(params["w_score"].T), params["b_score"],
    ]
    all_inputs = batch_inputs + weight_inputs

    # coarse cost estimate (advisory, for XLA scheduling / profiling)
    matmul_macs = (
        B * F * (2 * WORD_DIM) * D                      # relation_linear
        + 2 * (B * Q) * D * (B * F)                     # attention sim + att
        + NUM_LAYER * (
            2 * (B * E) * D * D                         # head + self(ent)
            + 2 * (B * F) * D * D                       # self(fact) + tail
            + 2 * (B * F) * (B * E) * D                 # e2f + f2e propagation
            + 2 * (B * E) * (3 * D) * D                 # fused e2e + e2q
        )
        + (B * E) * D                                   # score
    )
    bytes_accessed = int(sum(int(x.size) * x.dtype.itemsize for x in all_inputs)
                         + OUT_LANES * 4)
    cost = pl.CostEstimate(flops=int(2 * matmul_macs),
                           transcendentals=int((B * Q) * (B * F) + B * F),
                           bytes_accessed=bytes_accessed)

    # Single ungridded invocation: everything (<1 MiB) is VMEM-resident, shared
    # weights loaded exactly once, no per-grid-step pipeline/DMA bookkeeping.
    # TODO(synk): when BATCH scales, add a leading batch grid axis with
    # dimension_semantics=("parallel", ...) so v7x's 2nd TensorCore is used and
    # the working set stays within v7x's smaller VMEM budget.
    out = pl.pallas_call(
        graftnet_kernel,
        out_shape=jax.ShapeDtypeStruct((1, OUT_LANES), jnp.float32),
        compiler_params=pltpu.CompilerParams(vmem_limit_bytes=16 * 1024 * 1024),
        cost_estimate=cost,
    )(*all_inputs)
    return out[0, :B * E].reshape(B, E)


# ---------------- full forward (embeddings + LSTM glue + kernel + loss) ----------------
def graftnet_forward(local_entity, q2e_adj_mat, e2f_mat, f2e_mat, kb_fact_rel,
                     query_text, answer_dist, params):
    local_entity_mask = (local_entity != NUM_ENTITY).astype(jnp.float32)    # (B, E)
    query_mask = (query_text != NUM_WORD).astype(jnp.float32)               # (B, Q)
    pagerank_init = q2e_adj_mat[..., 0]                                     # (B, E)

    # query encoding (word embedding + node_encoder LSTM)
    query_word_emb = params["word_embedding"][query_text]                   # (B, Q, WORD_DIM)
    query_hidden_emb, query_node = lstm_forward(
        query_word_emb, params["lstm_w_ih"], params["lstm_w_hh"],
        params["lstm_b_ih"], params["lstm_b_hh"], ENTITY_DIM)
    query_node_emb = query_node[:, None, :]                                 # (B, 1, D)

    rel_emb = params["relation_embedding"][kb_fact_rel]                     # (B, F, 2*WORD_DIM)
    local_entity_emb = params["entity_embedding"][local_entity]             # (B, E, D)

    score = run_gnn_kernel(query_hidden_emb, query_mask, query_node_emb,
                           rel_emb, e2f_mat, f2e_mat, local_entity_emb,
                           pagerank_init, params)                           # (B, E)

    # BCEWithLogitsLoss (mean reduction), masking, sigmoid, argmax — cheap glue.
    loss = jnp.mean(jnp.maximum(score, 0.0) - score * answer_dist
                    + jnp.log1p(jnp.exp(-jnp.abs(score))))
    score_m = score + (1.0 - local_entity_mask) * VERY_NEG_NUMBER
    pred = jnp.argmax(score_m, axis=1)
    pred_dist = jax.nn.sigmoid(score_m) * local_entity_mask
    return loss, pred, pred_dist


# ---------------- deterministic parameter init ----------------
def init_params(key):
    keys = list(jax.random.split(key, 64))
    it = iter(keys)

    def nxt():
        return next(it)

    def lin(k, fan_in, fan_out):
        kw, kb = jax.random.split(k)
        bound = 1.0 / np.sqrt(fan_in)
        w = jax.random.uniform(kw, (fan_in, fan_out), jnp.float32, -bound, bound)
        b = jax.random.uniform(kb, (1, fan_out), jnp.float32, -bound, bound)
        return w, b

    params = {}
    # embeddings (padding row zeroed, as nn.Embedding(padding_idx=...))
    ent = jax.random.normal(nxt(), (NUM_ENTITY + 1, WORD_DIM), jnp.float32) * 0.1
    params["entity_embedding"] = ent.at[NUM_ENTITY].set(0.0)
    rel = jax.random.normal(nxt(), (NUM_RELATION + 1, 2 * WORD_DIM), jnp.float32) * 0.1
    params["relation_embedding"] = rel.at[NUM_RELATION].set(0.0)
    wrd = jax.random.normal(nxt(), (NUM_WORD + 1, WORD_DIM), jnp.float32) * 0.1
    params["word_embedding"] = wrd.at[NUM_WORD].set(0.0)

    # node_encoder LSTM
    h = ENTITY_DIM
    bound = 1.0 / np.sqrt(h)
    params["lstm_w_ih"] = jax.random.uniform(nxt(), (4 * h, WORD_DIM), jnp.float32, -bound, bound)
    params["lstm_w_hh"] = jax.random.uniform(nxt(), (4 * h, h), jnp.float32, -bound, bound)
    params["lstm_b_ih"] = jax.random.uniform(nxt(), (4 * h,), jnp.float32, -bound, bound)
    params["lstm_b_hh"] = jax.random.uniform(nxt(), (4 * h,), jnp.float32, -bound, bound)

    # relation_linear
    params["w_rel"], params["b_rel"] = lin(nxt(), 2 * WORD_DIM, ENTITY_DIM)

    # per-layer linears, stacked on a leading layer axis
    def stack_lin(fan_in, fan_out):
        ws, bs = [], []
        for _ in range(NUM_LAYER):
            w, b = lin(nxt(), fan_in, fan_out)
            ws.append(w)
            bs.append(b)
        return jnp.stack(ws), jnp.stack(bs)

    params["w_q2e"], params["b_q2e"] = stack_lin(ENTITY_DIM, ENTITY_DIM)
    params["w_self"], params["b_self"] = stack_lin(ENTITY_DIM, ENTITY_DIM)
    params["w_head"], params["b_head"] = stack_lin(ENTITY_DIM, ENTITY_DIM)
    params["w_tail"], params["b_tail"] = stack_lin(ENTITY_DIM, ENTITY_DIM)
    params["w_e2q"], params["b_e2q"] = stack_lin(K * ENTITY_DIM, ENTITY_DIM)
    params["w_e2e"], params["b_e2e"] = stack_lin(K * ENTITY_DIM, ENTITY_DIM)

    # score_func
    params["w_score"], params["b_score"] = lin(nxt(), ENTITY_DIM, 1)
    return params


if __name__ == "__main__":
    key = jax.random.PRNGKey(0)
    k_param, k_ent, k_rel, k_word = jax.random.split(key, 4)
    params = init_params(k_param)

    # synthetic batch (deterministic)
    local_entity = jax.random.randint(k_ent, (BATCH, MAX_LOCAL_ENTITY), 0, NUM_ENTITY)
    local_entity = local_entity.at[:, -2:].set(NUM_ENTITY)        # padded entities
    kb_fact_rel = jax.random.randint(k_rel, (BATCH, MAX_FACT), 0, NUM_RELATION)
    query_text = jax.random.randint(k_word, (BATCH, MAX_QUERY_WORD), 0, NUM_WORD)
    query_text = query_text.at[:, -2:].set(NUM_WORD)              # padded query words

    q2e_adj = np.zeros((BATCH, MAX_LOCAL_ENTITY, 1), np.float32)
    q2e_adj[:, 0, 0] = 1.0
    q2e_adj[:, 3, 0] = 1.0

    # dense realizations of the sparse entity2fact / fact2entity adjacency
    e2f = np.zeros((BATCH, MAX_FACT, MAX_LOCAL_ENTITY), np.float32)
    f2e = np.zeros((BATCH, MAX_LOCAL_ENTITY, MAX_FACT), np.float32)
    for b in range(BATCH):
        for f_ in range(MAX_FACT):
            head = (f_ + b) % (MAX_LOCAL_ENTITY - 2)
            tail = (3 * f_ + 1 + b) % (MAX_LOCAL_ENTITY - 2)
            e2f[b, f_, head] = 1.0
            f2e[b, tail, f_] = 1.0

    answer_dist = np.zeros((BATCH, MAX_LOCAL_ENTITY), np.float32)
    answer_dist[0, 5] = 1.0
    answer_dist[1, 7] = 1.0

    forward = jax.jit(graftnet_forward)
    loss, pred, pred_dist = forward(
        local_entity, jnp.asarray(q2e_adj), jnp.asarray(e2f), jnp.asarray(f2e),
        kb_fact_rel, query_text, jnp.asarray(answer_dist), params)

    jax.block_until_ready((loss, pred, pred_dist))
    print("KERNEL_OK")
</pallas_src>

<mosaic_0001>
module attributes {stable_mosaic.version = 11 : i64} {
  func.func @graftnet_kernel(%arg0: memref<16x32xf32, #tpu.memory_space<vmem>>, %arg1: memref<16x48xf32, #tpu.memory_space<vmem>>, %arg2: memref<2x32xf32, #tpu.memory_space<vmem>>, %arg3: memref<48x64xbf16, #tpu.memory_space<vmem>>, %arg4: memref<48x32xf32, #tpu.memory_space<vmem>>, %arg5: memref<32x48xf32, #tpu.memory_space<vmem>>, %arg6: memref<32x2xf32, #tpu.memory_space<vmem>>, %arg7: memref<48x2xf32, #tpu.memory_space<vmem>>, %arg8: memref<32x32xf32, #tpu.memory_space<vmem>>, %arg9: memref<32x1xf32, #tpu.memory_space<vmem>>, %arg10: memref<64x32xbf16, #tpu.memory_space<vmem>>, %arg11: memref<1x32xf32, #tpu.memory_space<vmem>>, %arg12: memref<2x32x32xbf16, #tpu.memory_space<vmem>>, %arg13: memref<2x1x32xf32, #tpu.memory_space<vmem>>, %arg14: memref<2x32x32xbf16, #tpu.memory_space<vmem>>, %arg15: memref<2x1x32xf32, #tpu.memory_space<vmem>>, %arg16: memref<2x32x32xbf16, #tpu.memory_space<vmem>>, %arg17: memref<2x1x32xf32, #tpu.memory_space<vmem>>, %arg18: memref<2x32x32xbf16, #tpu.memory_space<vmem>>, %arg19: memref<2x1x32xf32, #tpu.memory_space<vmem>>, %arg20: memref<2x96x32xbf16, #tpu.memory_space<vmem>>, %arg21: memref<2x1x32xf32, #tpu.memory_space<vmem>>, %arg22: memref<2x96x32xbf16, #tpu.memory_space<vmem>>, %arg23: memref<2x1x32xf32, #tpu.memory_space<vmem>>, %arg24: memref<1x32xbf16, #tpu.memory_space<vmem>>, %arg25: memref<1x1xf32, #tpu.memory_space<vmem>>, %arg26: memref<1x128xf32, #tpu.memory_space<vmem>>) attributes {dimension_semantics = [], scalar_prefetch = 0 : i64, scratch_operands = 0 : i64, tpu.core_type = #tpu.core_type<tc>} {
    %c0 = arith.constant 0 : index
    %c0_0 = arith.constant 0 : index
    %0 = vector.load %arg4[%c0, %c0_0] : memref<48x32xf32, #tpu.memory_space<vmem>>, vector<48x32xf32>
    %c0_1 = arith.constant 0 : index
    %c0_2 = arith.constant 0 : index
    %1 = vector.load %arg5[%c0_1, %c0_2] : memref<32x48xf32, #tpu.memory_space<vmem>>, vector<32x48xf32>
    %2 = arith.truncf %0 : vector<48x32xf32> to vector<48x32xbf16>
    %3 = arith.truncf %1 : vector<32x48xf32> to vector<32x48xbf16>
    %c0_3 = arith.constant 0 : index
    %c0_4 = arith.constant 0 : index
    %4 = vector.load %arg6[%c0_3, %c0_4] : memref<32x2xf32, #tpu.memory_space<vmem>>, vector<32x2xf32>
    %5 = arith.truncf %4 : vector<32x2xf32> to vector<32x2xbf16>
    %c0_5 = arith.constant 0 : index
    %c0_6 = arith.constant 0 : index
    %6 = vector.load %arg7[%c0_5, %c0_6] : memref<48x2xf32, #tpu.memory_space<vmem>>, vector<48x2xf32>
    %c0_7 = arith.constant 0 : index
    %c0_8 = arith.constant 0 : index
    %7 = vector.load %arg8[%c0_7, %c0_8] : memref<32x32xf32, #tpu.memory_space<vmem>>, vector<32x32xf32>
    %c0_9 = arith.constant 0 : index
    %c0_10 = arith.constant 0 : index
    %8 = vector.load %arg9[%c0_9, %c0_10] : memref<32x1xf32, #tpu.memory_space<vmem>>, vector<32x1xf32>
    %c0_11 = arith.constant 0 : index
    %c0_12 = arith.constant 0 : index
    %9 = vector.load %arg2[%c0_11, %c0_12] : memref<2x32xf32, #tpu.memory_space<vmem>>, vector<2x32xf32>
    %c0_13 = arith.constant 0 : index
    %c0_14 = arith.constant 0 : index
    %10 = vector.load %arg3[%c0_13, %c0_14] : memref<48x64xbf16, #tpu.memory_space<vmem>>, vector<48x64xbf16>
    %c0_15 = arith.constant 0 : index
    %c0_16 = arith.constant 0 : index
    %11 = vector.load %arg10[%c0_15, %c0_16] : memref<64x32xbf16, #tpu.memory_space<vmem>>, vector<64x32xbf16>
    %cst = arith.constant dense<0.000000e+00> : vector<48x32xf32>
    %12 = tpu.matmul %10, %11, %cst {dimension_numbers = #tpu.dot_dimension_numbers<[1], [0], [0], [1], [0, 0, 1, 1], [], []>} : vector<48x64xbf16>, vector<64x32xbf16>, vector<48x32xf32> -> vector<48x32xf32>
    %c0_17 = arith.constant 0 : index
    %c0_18 = arith.constant 0 : index
    %13 = vector.load %arg11[%c0_17, %c0_18] : memref<1x32xf32, #tpu.memory_space<vmem>>, vector<1x32xf32>
    %14 = vector.broadcast %13 : vector<1x32xf32> to vector<48x32xf32>
    %15 = arith.addf %12, %14 : vector<48x32xf32>
    %16 = arith.truncf %15 : vector<48x32xf32> to vector<48x32xbf16>
    %c0_19 = arith.constant 0 : index
    %c0_20 = arith.constant 0 : index
    %17 = vector.load %arg0[%c0_19, %c0_20] : memref<16x32xf32, #tpu.memory_space<vmem>>, vector<16x32xf32>
    %cst_21 = arith.constant 0.176776692 : f32
    %18 = vector.broadcast %cst_21 : f32 to vector<16x32xf32>
    %19 = arith.mulf %17, %18 : vector<16x32xf32>
    %cst_22 = arith.constant dense<0.000000e+00> : vector<16x48xf32>
    %20 = tpu.matmul %19, %15, %cst_22 {dimension_numbers = #tpu.dot_dimension_numbers<[1], [1], [0], [0], [0, 0, 1, 0], [], []>} : vector<16x32xf32>, vector<48x32xf32>, vector<16x48xf32> -> vector<16x48xf32>
    %c0_23 = arith.constant 0 : index
    %c0_24 = arith.constant 0 : index
    %21 = vector.load %arg1[%c0_23, %c0_24] : memref<16x48xf32, #tpu.memory_space<vmem>>, vector<16x48xf32>
    %22 = arith.addf %20, %21 : vector<16x48xf32>
    %cst_25 = arith.constant dense<0xFF800000> : vector<48xf32>
    %23 = vector.multi_reduction <maximumf>, %22, %cst_25 [0] : vector<16x48xf32> to vector<48xf32>
    %24 = vector.shape_cast %23 : vector<48xf32> to vector<1x48xf32>
    %25 = vector.broadcast %24 : vector<1x48xf32> to vector<16x48xf32>
    %26 = arith.subf %22, %25 : vector<16x48xf32>
    %27 = math.exp %26 : vector<16x48xf32>
    %cst_26 = arith.constant dense<0.000000e+00> : vector<48xf32>
    %28 = vector.multi_reduction <add>, %27, %cst_26 [0] : vector<16x48xf32> to vector<48xf32>
    %29 = vector.shape_cast %28 : vector<48xf32> to vector<1x48xf32>
    %cst_27 = arith.constant 1.000000e-10 : f32
    %30 = vector.broadcast %cst_27 : f32 to vector<1x48xf32>
    %31 = arith.maximumf %29, %30 : vector<1x48xf32>
    %32 = tpu.reciprocal %31 {approx = true} : vector<1x48xf32> -> vector<1x48xf32>
    %33 = vector.broadcast %32 : vector<1x48xf32> to vector<16x48xf32>
    %34 = arith.mulf %27, %33 : vector<16x48xf32>
    %cst_28 = arith.constant dense<0.000000e+00> : vector<48x32xf32>
    %35 = tpu.matmul %34, %19, %cst_28 {dimension_numbers = #tpu.dot_dimension_numbers<[0], [0], [1], [1], [0, 1, 1, 1], [], []>} : vector<16x48xf32>, vector<16x32xf32>, vector<48x32xf32> -> vector<48x32xf32>
    %36 = arith.mulf %35, %15 : vector<48x32xf32>
    %cst_29 = arith.constant dense<0.000000e+00> : vector<48xf32>
    %37 = vector.multi_reduction <add>, %36, %cst_29 [1] : vector<48x32xf32> to vector<48xf32>
    %38 = vector.shape_cast %37 : vector<48xf32> to vector<48x1xf32>
    %cst_30 = arith.constant 0.000000e+00 : f32
    %39 = vector.broadcast %cst_30 : f32 to vector<48x2xf32>
    %40 = arith.cmpf ogt, %6, %39 : vector<48x2xf32>
    %cst_31 = arith.constant -9.99999979E+10 : f32
    %41 = vector.shape_cast %38 : vector<48x1xf32> to vector<48x1xf32>
    %42 = vector.broadcast %41 : vector<48x1xf32> to vector<48x2xf32>
    %43 = vector.broadcast %cst_31 : f32 to vector<48x2xf32>
    %44 = arith.select %40, %42, %43 : vector<48x2xi1>, vector<48x2xf32>
    %cst_32 = arith.constant dense<0xFF800000> : vector<2xf32>
    %45 = vector.multi_reduction <maximumf>, %44, %cst_32 [0] : vector<48x2xf32> to vector<2xf32>
    %46 = vector.shape_cast %45 : vector<2xf32> to vector<1x2xf32>
    %47 = vector.broadcast %46 : vector<1x2xf32> to vector<48x2xf32>
    %48 = arith.mulf %6, %47 : vector<48x2xf32>
    %cst_33 = arith.constant dense<0.000000e+00> : vector<48xf32>
    %49 = vector.multi_reduction <add>, %48, %cst_33 [1] : vector<48x2xf32> to vector<48xf32>
    %50 = vector.shape_cast %49 : vector<48xf32> to vector<48x1xf32>
    %51 = arith.subf %38, %50 : vector<48x1xf32>
    %52 = math.exp %51 : vector<48x1xf32>
    %cst_34 = arith.constant dense<0.000000e+00> : vector<32x1xf32>
    %53 = tpu.matmul %0, %52, %cst_34 {dimension_numbers = #tpu.dot_dimension_numbers<[0], [0], [1], [1], [0, 1, 1, 1], [], []>} : vector<48x32xf32>, vector<48x1xf32>, vector<32x1xf32> -> vector<32x1xf32>
    %cst_35 = arith.constant 1.000000e-10 : f32
    %54 = vector.broadcast %cst_35 : f32 to vector<32x1xf32>
    %55 = arith.maximumf %53, %54 : vector<32x1xf32>
    %c0_36 = arith.constant 0 : index
    %c0_37 = arith.constant 0 : index
    %c0_38 = arith.constant 0 : index
    %56 = vector.load %arg12[%c0_36, %c0_37, %c0_38] : memref<2x32x32xbf16, #tpu.memory_space<vmem>>, vector<1x32x32xbf16>
    %57 = vector.shape_cast %56 : vector<1x32x32xbf16> to vector<32x32xbf16>
    %c0_39 = arith.constant 0 : index
    %c0_40 = arith.constant 0 : index
    %c0_41 = arith.constant 0 : index
    %58 = vector.load %arg13[%c0_39, %c0_40, %c0_41] : memref<2x1x32xf32, #tpu.memory_space<vmem>>, vector<1x1x32xf32>
    %59 = vector.shape_cast %58 : vector<1x1x32xf32> to vector<1x32xf32>
    %c0_42 = arith.constant 0 : index
    %c0_43 = arith.constant 0 : index
    %c0_44 = arith.constant 0 : index
    %60 = vector.load %arg14[%c0_42, %c0_43, %c0_44] : memref<2x32x32xbf16, #tpu.memory_space<vmem>>, vector<1x32x32xbf16>
    %61 = vector.shape_cast %60 : vector<1x32x32xbf16> to vector<32x32xbf16>
    %c0_45 = arith.constant 0 : index
    %c0_46 = arith.constant 0 : index
    %c0_47 = arith.constant 0 : index
    %62 = vector.load %arg15[%c0_45, %c0_46, %c0_47] : memref<2x1x32xf32, #tpu.memory_space<vmem>>, vector<1x1x32xf32>
    %63 = vector.shape_cast %62 : vector<1x1x32xf32> to vector<1x32xf32>
    %c0_48 = arith.constant 0 : index
    %c0_49 = arith.constant 0 : index
    %c0_50 = arith.constant 0 : index
    %64 = vector.load %arg16[%c0_48, %c0_49, %c0_50] : memref<2x32x32xbf16, #tpu.memory_space<vmem>>, vector<1x32x32xbf16>
    %65 = vector.shape_cast %64 : vector<1x32x32xbf16> to vector<32x32xbf16>
    %c0_51 = arith.constant 0 : index
    %c0_52 = arith.constant 0 : index
    %c0_53 = arith.constant 0 : index
    %66 = vector.load %arg17[%c0_51, %c0_52, %c0_53] : memref<2x1x32xf32, #tpu.memory_space<vmem>>, vector<1x1x32xf32>
    %67 = vector.shape_cast %66 : vector<1x1x32xf32> to vector<1x32xf32>
    %c0_54 = arith.constant 0 : index
    %c0_55 = arith.constant 0 : index
    %c0_56 = arith.constant 0 : index
    %68 = vector.load %arg18[%c0_54, %c0_55, %c0_56] : memref<2x32x32xbf16, #tpu.memory_space<vmem>>, vector<1x32x32xbf16>
    %69 = vector.shape_cast %68 : vector<1x32x32xbf16> to vector<32x32xbf16>
    %c0_57 = arith.constant 0 : index
    %c0_58 = arith.constant 0 : index
    %c0_59 = arith.constant 0 : index
    %70 = vector.load %arg19[%c0_57, %c0_58, %c0_59] : memref<2x1x32xf32, #tpu.memory_space<vmem>>, vector<1x1x32xf32>
    %71 = vector.shape_cast %70 : vector<1x1x32xf32> to vector<1x32xf32>
    %c0_60 = arith.constant 0 : index
    %c0_61 = arith.constant 0 : index
    %c0_62 = arith.constant 0 : index
    %72 = vector.load %arg20[%c0_60, %c0_61, %c0_62] : memref<2x96x32xbf16, #tpu.memory_space<vmem>>, vector<1x96x32xbf16>
    %73 = vector.shape_cast %72 : vector<1x96x32xbf16> to vector<96x32xbf16>
    %c0_63 = arith.constant 0 : index
    %c0_64 = arith.constant 0 : index
    %c0_65 = arith.constant 0 : index
    %74 = vector.load %arg21[%c0_63, %c0_64, %c0_65] : memref<2x1x32xf32, #tpu.memory_space<vmem>>, vector<1x1x32xf32>
    %75 = vector.shape_cast %74 : vector<1x1x32xf32> to vector<1x32xf32>
    %c0_66 = arith.constant 0 : index
    %c0_67 = arith.constant 0 : index
    %c0_68 = arith.constant 0 : index
    %76 = vector.load %arg22[%c0_66, %c0_67, %c0_68] : memref<2x96x32xbf16, #tpu.memory_space<vmem>>, vector<1x96x32xbf16>
    %77 = vector.shape_cast %76 : vector<1x96x32xbf16> to vector<96x32xbf16>
    %c0_69 = arith.constant 0 : index
    %c0_70 = arith.constant 0 : index
    %c0_71 = arith.constant 0 : index
    %78 = vector.load %arg23[%c0_69, %c0_70, %c0_71] : memref<2x1x32xf32, #tpu.memory_space<vmem>>, vector<1x1x32xf32>
    %79 = vector.shape_cast %78 : vector<1x1x32xf32> to vector<1x32xf32>
    %80 = arith.truncf %7 : vector<32x32xf32> to vector<32x32xbf16>
    %cst_72 = arith.constant dense<0.000000e+00> : vector<32x32xf32>
    %81 = tpu.matmul %80, %65, %cst_72 {dimension_numbers = #tpu.dot_dimension_numbers<[1], [0], [0], [1], [0, 0, 1, 1], [], []>} : vector<32x32xbf16>, vector<32x32xbf16>, vector<32x32xf32> -> vector<32x32xf32>
    %82 = vector.broadcast %67 : vector<1x32xf32> to vector<32x32xf32>
    %83 = arith.addf %81, %82 : vector<32x32xf32>
    %cst_73 = arith.constant dense<0.000000e+00> : vector<32x32xf32>
    %84 = tpu.matmul %80, %61, %cst_73 {dimension_numbers = #tpu.dot_dimension_numbers<[1], [0], [0], [1], [0, 0, 1, 1], [], []>} : vector<32x32xbf16>, vector<32x32xbf16>, vector<32x32xf32> -> vector<32x32xf32>
    %85 = vector.broadcast %63 : vector<1x32xf32> to vector<32x32xf32>
    %86 = arith.addf %84, %85 : vector<32x32xf32>
    %cst_74 = arith.constant dense<0.000000e+00> : vector<48x32xf32>
    %87 = tpu.matmul %16, %61, %cst_74 {dimension_numbers = #tpu.dot_dimension_numbers<[1], [0], [0], [1], [0, 0, 1, 1], [], []>} : vector<48x32xbf16>, vector<32x32xbf16>, vector<48x32xf32> -> vector<48x32xf32>
    %88 = vector.broadcast %63 : vector<1x32xf32> to vector<48x32xf32>
    %89 = arith.addf %87, %88 : vector<48x32xf32>
    %90 = arith.truncf %83 : vector<32x32xf32> to vector<32x32xbf16>
    %cst_75 = arith.constant dense<0.000000e+00> : vector<48x32xf32>
    %91 = tpu.matmul %2, %90, %cst_75 {dimension_numbers = #tpu.dot_dimension_numbers<[1], [0], [0], [1], [0, 0, 1, 1], [], []>} : vector<48x32xbf16>, vector<32x32xbf16>, vector<48x32xf32> -> vector<48x32xf32>
    %92 = arith.addf %89, %91 : vector<48x32xf32>
    %cst_76 = arith.constant 0.000000e+00 : f32
    %93 = vector.broadcast %cst_76 : f32 to vector<48x32xf32>
    %94 = arith.maximumf %92, %93 : vector<48x32xf32>
    %95 = arith.divf %8, %55 : vector<32x1xf32>
    %cst_77 = arith.constant dense<0.000000e+00> : vector<48x1xf32>
    %96 = tpu.matmul %0, %95, %cst_77 {dimension_numbers = #tpu.dot_dimension_numbers<[1], [0], [0], [1], [0, 0, 1, 1], [], []>} : vector<48x32xf32>, vector<32x1xf32>, vector<48x1xf32> -> vector<48x1xf32>
    %97 = arith.mulf %52, %96 : vector<48x1xf32>
    %98 = vector.broadcast %97 : vector<48x1xf32> to vector<48x32xf32>
    %99 = arith.mulf %94, %98 : vector<48x32xf32>
    %100 = arith.truncf %99 : vector<48x32xf32> to vector<48x32xbf16>
    %cst_78 = arith.constant dense<0.000000e+00> : vector<48x32xf32>
    %101 = tpu.matmul %100, %69, %cst_78 {dimension_numbers = #tpu.dot_dimension_numbers<[1], [0], [0], [1], [0, 0, 1, 1], [], []>} : vector<48x32xbf16>, vector<32x32xbf16>, vector<48x32xf32> -> vector<48x32xf32>
    %102 = vector.broadcast %71 : vector<1x32xf32> to vector<48x32xf32>
    %103 = arith.addf %101, %102 : vector<48x32xf32>
    %104 = arith.truncf %103 : vector<48x32xf32> to vector<48x32xbf16>
    %cst_79 = arith.constant dense<0.000000e+00> : vector<32x32xf32>
    %105 = tpu.matmul %3, %104, %cst_79 {dimension_numbers = #tpu.dot_dimension_numbers<[1], [0], [0], [1], [0, 0, 1, 1], [], []>} : vector<32x48xbf16>, vector<48x32xbf16>, vector<32x32xf32> -> vector<32x32xf32>
    %106 = arith.addf %86, %105 : vector<32x32xf32>
    %cst_80 = arith.constant 0.000000e+00 : f32
    %107 = vector.broadcast %cst_80 : f32 to vector<32x32xf32>
    %108 = arith.maximumf %106, %107 : vector<32x32xf32>
    %cst_81 = arith.constant dense<0.000000e+00> : vector<32x1xf32>
    %109 = tpu.matmul %1, %97, %cst_81 {dimension_numbers = #tpu.dot_dimension_numbers<[1], [0], [0], [1], [0, 0, 1, 1], [], []>} : vector<32x48xf32>, vector<48x1xf32>, vector<32x1xf32> -> vector<32x1xf32>
    %cst_82 = arith.constant 8.000000e-01 : f32
    %110 = vector.broadcast %cst_82 : f32 to vector<32x1xf32>
    %111 = arith.mulf %110, %109 : vector<32x1xf32>
    %cst_83 = arith.constant 2.000000e-01 : f32
    %112 = vector.broadcast %cst_83 : f32 to vector<32x1xf32>
    %113 = arith.mulf %112, %8 : vector<32x1xf32>
    %114 = arith.addf %111, %113 : vector<32x1xf32>
    %115 = arith.truncf %9 : vector<2x32xf32> to vector<2x32xbf16>
    %cst_84 = arith.constant dense<0.000000e+00> : vector<2x32xf32>
    %116 = tpu.matmul %115, %57, %cst_84 {dimension_numbers = #tpu.dot_dimension_numbers<[1], [0], [0], [1], [0, 0, 1, 1], [], []>} : vector<2x32xbf16>, vector<32x32xbf16>, vector<2x32xf32> -> vector<2x32xf32>
    %117 = vector.broadcast %59 : vector<1x32xf32> to vector<2x32xf32>
    %118 = arith.addf %116, %117 : vector<2x32xf32>
    %119 = arith.truncf %118 : vector<2x32xf32> to vector<2x32xbf16>
    %cst_85 = arith.constant dense<0.000000e+00> : vector<32x32xf32>
    %120 = tpu.matmul %5, %119, %cst_85 {dimension_numbers = #tpu.dot_dimension_numbers<[1], [0], [0], [1], [0, 0, 1, 1], [], []>} : vector<32x2xbf16>, vector<2x32xbf16>, vector<32x32xf32> -> vector<32x32xf32>
    %121 = tpu.concatenate %7, %120, %108 in 1 : vector<32x32xf32>, vector<32x32xf32>, vector<32x32xf32> -> vector<32x96xf32>
    %122 = arith.truncf %121 : vector<32x96xf32> to vector<32x96xbf16>
    %cst_86 = arith.constant dense<0.000000e+00> : vector<32x32xf32>
    %123 = tpu.matmul %122, %77, %cst_86 {dimension_numbers = #tpu.dot_dimension_numbers<[1], [0], [0], [1], [0, 0, 1, 1], [], []>} : vector<32x96xbf16>, vector<96x32xbf16>, vector<32x32xf32> -> vector<32x32xf32>
    %124 = vector.broadcast %79 : vector<1x32xf32> to vector<32x32xf32>
    %125 = arith.addf %123, %124 : vector<32x32xf32>
    %cst_87 = arith.constant 0.000000e+00 : f32
    %126 = vector.broadcast %cst_87 : f32 to vector<32x32xf32>
    %127 = arith.maximumf %125, %126 : vector<32x32xf32>
    %cst_88 = arith.constant dense<0.000000e+00> : vector<32x32xf32>
    %128 = tpu.matmul %122, %73, %cst_88 {dimension_numbers = #tpu.dot_dimension_numbers<[1], [0], [0], [1], [0, 0, 1, 1], [], []>} : vector<32x96xbf16>, vector<96x32xbf16>, vector<32x32xf32> -> vector<32x32xf32>
    %129 = vector.broadcast %75 : vector<1x32xf32> to vector<32x32xf32>
    %130 = arith.addf %128, %129 : vector<32x32xf32>
    %131 = vector.broadcast %114 : vector<32x1xf32> to vector<32x2xf32>
    %132 = arith.mulf %4, %131 : vector<32x2xf32>
    %cst_89 = arith.constant dense<0.000000e+00> : vector<2x32xf32>
    %133 = tpu.matmul %132, %130, %cst_89 {dimension_numbers = #tpu.dot_dimension_numbers<[0], [0], [1], [1], [0, 1, 1, 1], [], []>} : vector<32x2xf32>, vector<32x32xf32>, vector<2x32xf32> -> vector<2x32xf32>
    %c1 = arith.constant 1 : index
    %c0_90 = arith.constant 0 : index
    %c0_91 = arith.constant 0 : index
    %134 = vector.load %arg12[%c1, %c0_90, %c0_91] : memref<2x32x32xbf16, #tpu.memory_space<vmem>>, vector<1x32x32xbf16>
    %135 = vector.shape_cast %134 : vector<1x32x32xbf16> to vector<32x32xbf16>
    %c1_92 = arith.constant 1 : index
    %c0_93 = arith.constant 0 : index
    %c0_94 = arith.constant 0 : index
    %136 = vector.load %arg13[%c1_92, %c0_93, %c0_94] : memref<2x1x32xf32, #tpu.memory_space<vmem>>, vector<1x1x32xf32>
    %137 = vector.shape_cast %136 : vector<1x1x32xf32> to vector<1x32xf32>
    %c1_95 = arith.constant 1 : index
    %c0_96 = arith.constant 0 : index
    %c0_97 = arith.constant 0 : index
    %138 = vector.load %arg14[%c1_95, %c0_96, %c0_97] : memref<2x32x32xbf16, #tpu.memory_space<vmem>>, vector<1x32x32xbf16>
    %139 = vector.shape_cast %138 : vector<1x32x32xbf16> to vector<32x32xbf16>
    %c1_98 = arith.constant 1 : index
    %c0_99 = arith.constant 0 : index
    %c0_100 = arith.constant 0 : index
    %140 = vector.load %arg15[%c1_98, %c0_99, %c0_100] : memref<2x1x32xf32, #tpu.memory_space<vmem>>, vector<1x1x32xf32>
    %141 = vector.shape_cast %140 : vector<1x1x32xf32> to vector<1x32xf32>
    %c1_101 = arith.constant 1 : index
    %c0_102 = arith.constant 0 : index
    %c0_103 = arith.constant 0 : index
    %142 = vector.load %arg16[%c1_101, %c0_102, %c0_103] : memref<2x32x32xbf16, #tpu.memory_space<vmem>>, vector<1x32x32xbf16>
    %143 = vector.shape_cast %142 : vector<1x32x32xbf16> to vector<32x32xbf16>
    %c1_104 = arith.constant 1 : index
    %c0_105 = arith.constant 0 : index
    %c0_106 = arith.constant 0 : index
    %144 = vector.load %arg17[%c1_104, %c0_105, %c0_106] : memref<2x1x32xf32, #tpu.memory_space<vmem>>, vector<1x1x32xf32>
    %145 = vector.shape_cast %144 : vector<1x1x32xf32> to vector<1x32xf32>
    %c1_107 = arith.constant 1 : index
    %c0_108 = arith.constant 0 : index
    %c0_109 = arith.constant 0 : index
    %146 = vector.load %arg18[%c1_107, %c0_108, %c0_109] : memref<2x32x32xbf16, #tpu.memory_space<vmem>>, vector<1x32x32xbf16>
    %147 = vector.shape_cast %146 : vector<1x32x32xbf16> to vector<32x32xbf16>
    %c1_110 = arith.constant 1 : index
    %c0_111 = arith.constant 0 : index
    %c0_112 = arith.constant 0 : index
    %148 = vector.load %arg19[%c1_110, %c0_111, %c0_112] : memref<2x1x32xf32, #tpu.memory_space<vmem>>, vector<1x1x32xf32>
    %149 = vector.shape_cast %148 : vector<1x1x32xf32> to vector<1x32xf32>
    %c1_113 = arith.constant 1 : index
    %c0_114 = arith.constant 0 : index
    %c0_115 = arith.constant 0 : index
    %150 = vector.load %arg22[%c1_113, %c0_114, %c0_115] : memref<2x96x32xbf16, #tpu.memory_space<vmem>>, vector<1x96x32xbf16>
    %151 = vector.shape_cast %150 : vector<1x96x32xbf16> to vector<96x32xbf16>
    %c1_116 = arith.constant 1 : index
    %c0_117 = arith.constant 0 : index
    %c0_118 = arith.constant 0 : index
    %152 = vector.load %arg23[%c1_116, %c0_117, %c0_118] : memref<2x1x32xf32, #tpu.memory_space<vmem>>, vector<1x1x32xf32>
    %153 = vector.shape_cast %152 : vector<1x1x32xf32> to vector<1x32xf32>
    %154 = arith.truncf %127 : vector<32x32xf32> to vector<32x32xbf16>
    %cst_119 = arith.constant dense<0.000000e+00> : vector<32x32xf32>
    %155 = tpu.matmul %154, %143, %cst_119 {dimension_numbers = #tpu.dot_dimension_numbers<[1], [0], [0], [1], [0, 0, 1, 1], [], []>} : vector<32x32xbf16>, vector<32x32xbf16>, vector<32x32xf32> -> vector<32x32xf32>
    %156 = vector.broadcast %145 : vector<1x32xf32> to vector<32x32xf32>
    %157 = arith.addf %155, %156 : vector<32x32xf32>
    %cst_120 = arith.constant dense<0.000000e+00> : vector<32x32xf32>
    %158 = tpu.matmul %154, %139, %cst_120 {dimension_numbers = #tpu.dot_dimension_numbers<[1], [0], [0], [1], [0, 0, 1, 1], [], []>} : vector<32x32xbf16>, vector<32x32xbf16>, vector<32x32xf32> -> vector<32x32xf32>
    %159 = vector.broadcast %141 : vector<1x32xf32> to vector<32x32xf32>
    %160 = arith.addf %158, %159 : vector<32x32xf32>
    %cst_121 = arith.constant dense<0.000000e+00> : vector<48x32xf32>
    %161 = tpu.matmul %16, %139, %cst_121 {dimension_numbers = #tpu.dot_dimension_numbers<[1], [0], [0], [1], [0, 0, 1, 1], [], []>} : vector<48x32xbf16>, vector<32x32xbf16>, vector<48x32xf32> -> vector<48x32xf32>
    %162 = vector.broadcast %141 : vector<1x32xf32> to vector<48x32xf32>
    %163 = arith.addf %161, %162 : vector<48x32xf32>
    %164 = arith.truncf %157 : vector<32x32xf32> to vector<32x32xbf16>
    %cst_122 = arith.constant dense<0.000000e+00> : vector<48x32xf32>
    %165 = tpu.matmul %2, %164, %cst_122 {dimension_numbers = #tpu.dot_dimension_numbers<[1], [0], [0], [1], [0, 0, 1, 1], [], []>} : vector<48x32xbf16>, vector<32x32xbf16>, vector<48x32xf32> -> vector<48x32xf32>
    %166 = arith.addf %163, %165 : vector<48x32xf32>
    %cst_123 = arith.constant 0.000000e+00 : f32
    %167 = vector.broadcast %cst_123 : f32 to vector<48x32xf32>
    %168 = arith.maximumf %166, %167 : vector<48x32xf32>
    %169 = arith.divf %114, %55 : vector<32x1xf32>
    %cst_124 = arith.constant dense<0.000000e+00> : vector<48x1xf32>
    %170 = tpu.matmul %0, %169, %cst_124 {dimension_numbers = #tpu.dot_dimension_numbers<[1], [0], [0], [1], [0, 0, 1, 1], [], []>} : vector<48x32xf32>, vector<32x1xf32>, vector<48x1xf32> -> vector<48x1xf32>
    %171 = arith.mulf %52, %170 : vector<48x1xf32>
    %172 = vector.broadcast %171 : vector<48x1xf32> to vector<48x32xf32>
    %173 = arith.mulf %168, %172 : vector<48x32xf32>
    %174 = arith.truncf %173 : vector<48x32xf32> to vector<48x32xbf16>
    %cst_125 = arith.constant dense<0.000000e+00> : vector<48x32xf32>
    %175 = tpu.matmul %174, %147, %cst_125 {dimension_numbers = #tpu.dot_dimension_numbers<[1], [0], [0], [1], [0, 0, 1, 1], [], []>} : vector<48x32xbf16>, vector<32x32xbf16>, vector<48x32xf32> -> vector<48x32xf32>
    %176 = vector.broadcast %149 : vector<1x32xf32> to vector<48x32xf32>
    %177 = arith.addf %175, %176 : vector<48x32xf32>
    %178 = arith.truncf %177 : vector<48x32xf32> to vector<48x32xbf16>
    %cst_126 = arith.constant dense<0.000000e+00> : vector<32x32xf32>
    %179 = tpu.matmul %3, %178, %cst_126 {dimension_numbers = #tpu.dot_dimension_numbers<[1], [0], [0], [1], [0, 0, 1, 1], [], []>} : vector<32x48xbf16>, vector<48x32xbf16>, vector<32x32xf32> -> vector<32x32xf32>
    %180 = arith.addf %160, %179 : vector<32x32xf32>
    %cst_127 = arith.constant 0.000000e+00 : f32
    %181 = vector.broadcast %cst_127 : f32 to vector<32x32xf32>
    %182 = arith.maximumf %180, %181 : vector<32x32xf32>
    %183 = arith.truncf %133 : vector<2x32xf32> to vector<2x32xbf16>
    %cst_128 = arith.constant dense<0.000000e+00> : vector<2x32xf32>
    %184 = tpu.matmul %183, %135, %cst_128 {dimension_numbers = #tpu.dot_dimension_numbers<[1], [0], [0], [1], [0, 0, 1, 1], [], []>} : vector<2x32xbf16>, vector<32x32xbf16>, vector<2x32xf32> -> vector<2x32xf32>
    %185 = vector.broadcast %137 : vector<1x32xf32> to vector<2x32xf32>
    %186 = arith.addf %184, %185 : vector<2x32xf32>
    %187 = arith.truncf %186 : vector<2x32xf32> to vector<2x32xbf16>
    %cst_129 = arith.constant dense<0.000000e+00> : vector<32x32xf32>
    %188 = tpu.matmul %5, %187, %cst_129 {dimension_numbers = #tpu.dot_dimension_numbers<[1], [0], [0], [1], [0, 0, 1, 1], [], []>} : vector<32x2xbf16>, vector<2x32xbf16>, vector<32x32xf32> -> vector<32x32xf32>
    %189 = tpu.concatenate %127, %188, %182 in 1 : vector<32x32xf32>, vector<32x32xf32>, vector<32x32xf32> -> vector<32x96xf32>
    %190 = arith.truncf %189 : vector<32x96xf32> to vector<32x96xbf16>
    %cst_130 = arith.constant dense<0.000000e+00> : vector<32x32xf32>
    %191 = tpu.matmul %190, %151, %cst_130 {dimension_numbers = #tpu.dot_dimension_numbers<[1], [0], [0], [1], [0, 0, 1, 1], [], []>} : vector<32x96xbf16>, vector<96x32xbf16>, vector<32x32xf32> -> vector<32x32xf32>
    %192 = vector.broadcast %153 : vector<1x32xf32> to vector<32x32xf32>
    %193 = arith.addf %191, %192 : vector<32x32xf32>
    %cst_131 = arith.constant 0.000000e+00 : f32
    %194 = vector.broadcast %cst_131 : f32 to vector<32x32xf32>
    %195 = arith.maximumf %193, %194 : vector<32x32xf32>
    %c0_132 = arith.constant 0 : index
    %c0_133 = arith.constant 0 : index
    %196 = vector.load %arg24[%c0_132, %c0_133] : memref<1x32xbf16, #tpu.memory_space<vmem>>, vector<1x32xbf16>
    %197 = arith.truncf %195 : vector<32x32xf32> to vector<32x32xbf16>
    %cst_134 = arith.constant dense<0.000000e+00> : vector<1x32xf32>
    %198 = tpu.matmul %196, %197, %cst_134 {dimension_numbers = #tpu.dot_dimension_numbers<[1], [1], [0], [0], [0, 0, 1, 0], [], []>} : vector<1x32xbf16>, vector<32x32xbf16>, vector<1x32xf32> -> vector<1x32xf32>
    %c0_135 = arith.constant 0 : index
    %c0_136 = arith.constant 0 : index
    %199 = vector.load %arg25[%c0_135, %c0_136] : memref<1x1xf32, #tpu.memory_space<vmem>>, vector<1x1xf32>
    %200 = vector.broadcast %199 : vector<1x1xf32> to vector<1x32xf32>
    %201 = arith.addf %198, %200 : vector<1x32xf32>
    %cst_137 = arith.constant 0.000000e+00 : f32
    %202 = vector.broadcast %cst_137 : f32 to vector<1x96xf32>
    %203 = tpu.concatenate %201, %202 in 1 : vector<1x32xf32>, vector<1x96xf32> -> vector<1x128xf32>
    %c0_138 = arith.constant 0 : index
    %c0_139 = arith.constant 0 : index
    %204 = vector.load %arg26[%c0_138, %c0_139] : memref<1x128xf32, #tpu.memory_space<vmem>>, vector<1x128xf32>
    tpu.vector_store %arg26[%c0_138, %c0_139], %203 {strides = array<i32>} : memref<1x128xf32, #tpu.memory_space<vmem>>, vector<1x128xf32>,
    return
  }
}

</mosaic_0001>

<bundles_post_ra>
// kernel: custom-call.8
= control target key start
LH: loop header
LB: loop body
LE: loop exit
PB: predicated region body
PF: predicated region fallthrough
CT: control target
= control target key end

     0   :  { %s6_s0 = inlined_call_operand.vmem [shape: f32[8,2,32], index: 0, kind: output, shape index: {}]  }

// kernel: custom-call
= control target key start
LH: loop header
LB: loop body
LE: loop exit
PB: predicated region body
PF: predicated region fallthrough
CT: control target
= control target key end

     0   :  { %s6_s0 = inlined_call_operand.vmem [shape: f32[2,32], index: 0, kind: output, shape index: {}]  }

// kernel: squeeze.2
= control target key start
LH: loop header
LB: loop body
LE: loop exit
PB: predicated region body
PF: predicated region fallthrough
CT: control target
= control target key end

     0   :  { %s130_s8 = smov 125   ;;  %s131_s9 = smov 126   ;;  %vm7_vm0 = vcmask 7168   ;;  %s221_s0 = inlined_call_operand.vmem [shape: f32[2,16], index: 0, kind: input, shape index: {}]   ;;  %s222_s1 = inlined_call_operand.vmem [shape: f32[32,1], index: 1, kind: output, shape index: {}]  }
   0x1   :  { %v4_v0 = vld [vmem:[%s221_s0] sm:$0x3]  ;;  %s129_s0 = smov 127   ;;  %s132_s10 = smov 124  }
   0x2   :  { %5 = vst [vmem:[#allocation0] sm:$0x3] %v4_v0  ;;  %s133_s11 = smov 123   ;;  %s134_s12 = smov 122  }
   0x3   :  { %s135_s13 = smov 121   ;;  %s136_s14 = smov 120  }
   0x4   :  { %s137_s17 = smov 119   ;;  %s138_s18 = smov 118  }
   0x5   :  { %s139_s19 = smov 117   ;;  %s140_s20 = smov 116  }
   0x6   :  { %s141_s21 = smov 115   ;;  %s142_s22 = smov 114  }
   0x7   :  { %s143_s23 = smov 113  }
   0x9   :  { %v9_v1 = vld [vmem:[#allocation0] sm:$0x3]  }
   0xa   :  { %v21_v2 = vld [vmem:[#allocation0] sm:$0x3]   ;;  %10 = vrot.lane.b32.xlu0 %v9_v1, %s129_s0 }
   0xb   :  { %22 = vrot.lane.b32.xlu1 %v21_v2, %s130_s8  ;;  %v15_v3 = vld [vmem:[#allocation0] sm:$0x3]  }
   0xc   :  { %v27_v4 = vld [vmem:[#allocation0] sm:$0x3]  }
   0xd   :  { %v33_v5 = vld [vmem:[#allocation0] sm:$0x3]  }
   0xe   :  { %16 = vrot.lane.b32.xlu0 %v15_v3, %s131_s9  ;;  %v39_v6 = vld [vmem:[#allocation0] sm:$0x3]  }
   0xf   :  { %28 = vrot.lane.b32.xlu1 %v27_v4, %s132_s10  ;;  %v45_v7 = vld [vmem:[#allocation0] sm:$0x3]  }
  0x10   :  { %v51_v8 = vld [vmem:[#allocation0] sm:$0x3]  }
  0x11   :  { %v57_v9 = vld [vmem:[#allocation0] sm:$0x3]  }
  0x12   :  { %34 = vrot.lane.b32.xlu0 %v33_v5, %s133_s11  ;;  %v63_v10 = vld [vmem:[#allocation0] sm:$0x3]  }
  0x13   :  { %40 = vrot.lane.b32.xlu1 %v39_v6, %s134_s12  ;;  %v6_v11 = vld [vmem:[#allocation0] sm:$0x3]  }
  0x14   :  { %8 = vst.msk [vmem:[%s222_s1] ss:$16 sm:$0x3] %vm7_vm0, %v6_v11   ;;  %v69_v12 = vld [vmem:[#allocation0] sm:$0x3]  }
  0x15   :  { %v75_v13 = vld [vmem:[#allocation0] sm:$0x3]  }
  0x16   :  { %46 = vrot.lane.b32.xlu0 %v45_v7, %s135_s13  ;;  %v81_v14 = vld [vmem:[#allocation0] sm:$0x3]  }
  0x17   :  { %52 = vrot.lane.b32.xlu1 %v51_v8, %s136_s14  ;;  %v87_v15 = vld [vmem:[#allocation0] sm:$0x3]  }
  0x18   :  { %v93_v16 = vld [vmem:[#allocation0] sm:$0x3]  }
  0x1a   :  { %58 = vrot.lane.b32.xlu0 %v57_v9, %s137_s17 }
  0x1b   :  { %64 = vrot.lane.b32.xlu1 %v63_v10, %s138_s18 }
  0x1e   :  { %70 = vrot.lane.b32.xlu0 %v69_v12, %s139_s19 }
  0x1f   :  { %76 = vrot.lane.b32.xlu1 %v75_v13, %s140_s20 }
  0x22   :  { %82 = vrot.lane.b32.xlu0 %v81_v14, %s141_s21 }
  0x23   :  { %88 = vrot.lane.b32.xlu1 %v87_v15, %s142_s22 }
  0x26   :  { %94 = vrot.lane.b32.xlu0 %v93_v16, %s143_s23 }
  0x7c   :  { %v11_v17 = vpop.permute.xlu0 %10  }
  0x7d   :  { %v23_v18 = vpop.permute.xlu1 %22   ;;  %99 = vst.msk [vmem:[%s222_s1 + $0x1] ss:$16 sm:$0x3] %vm7_vm0, %v11_v17  }
  0x7e   :  { %101 = vst.msk [vmem:[%s222_s1 + $0x3] ss:$16 sm:$0x3] %vm7_vm0, %v23_v18  }
  0x80   :  { %v17_v19 = vpop.permute.xlu0 %16  }
  0x81   :  { %v29_v20 = vpop.permute.xlu1 %28   ;;  %100 = vst.msk [vmem:[%s222_s1 + $0x2] ss:$16 sm:$0x3] %vm7_vm0, %v17_v19  }
  0x82   :  { %102 = vst.msk [vmem:[%s222_s1 + $0x4] ss:$16 sm:$0x3] %vm7_vm0, %v29_v20  }
  0x84   :  { %v35_v21 = vpop.permute.xlu0 %34  }
  0x85   :  { %v41_v22 = vpop.permute.xlu1 %40   ;;  %103 = vst.msk [vmem:[%s222_s1 + $0x5] ss:$16 sm:$0x3] %vm7_vm0, %v35_v21  }
  0x86   :  { %104 = vst.msk [vmem:[%s222_s1 + $0x6] ss:$16 sm:$0x3] %vm7_vm0, %v41_v22  }
  0x88   :  { %v47_v23 = vpop.permute.xlu0 %46  }
  0x89   :  { %v53_v24 = vpop.permute.xlu1 %52   ;;  %105 = vst.msk [vmem:[%s222_s1 + $0x7] ss:$16 sm:$0x3] %vm7_vm0, %v47_v23  }
  0x8a   :  { %106 = vst.msk [vmem:[%s222_s1 + $0x8] ss:$16 sm:$0x3] %vm7_vm0, %v53_v24  }
  0x8c   :  { %v59_v25 = vpop.permute.xlu0 %58  }
  0x8d   :  { %v65_v26 = vpop.permute.xlu1 %64   ;;  %107 = vst.msk [vmem:[%s222_s1 + $0x9] ss:$16 sm:$0x3] %vm7_vm0, %v59_v25  }
  0x8e   :  { %108 = vst.msk [vmem:[%s222_s1 + $0xa] ss:$16 sm:$0x3] %vm7_vm0, %v65_v26  }
  0x90   :  { %v71_v27 = vpop.permute.xlu0 %70  }
  0x91   :  { %v77_v28 = vpop.permute.xlu1 %76   ;;  %109 = vst.msk [vmem:[%s222_s1 + $0xb] ss:$16 sm:$0x3] %vm7_vm0, %v71_v27  }
  0x92   :  { %110 = vst.msk [vmem:[%s222_s1 + $0xc] ss:$16 sm:$0x3] %vm7_vm0, %v77_v28  }
  0x94   :  { %v83_v29 = vpop.permute.xlu0 %82  }
  0x95   :  { %v89_v30 = vpop.permute.xlu1 %88   ;;  %111 = vst.msk [vmem:[%s222_s1 + $0xd] ss:$16 sm:$0x3] %vm7_vm0, %v83_v29  }
  0x96   :  { %112 = vst.msk [vmem:[%s222_s1 + $0xe] ss:$16 sm:$0x3] %vm7_vm0, %v89_v30  }
  0x98   :  { %v95_v31 = vpop.permute.xlu0 %94  }
  0x99   :  { %113 = vst.msk [vmem:[%s222_s1 + $0xf] ss:$16 sm:$0x3] %vm7_vm0, %v95_v31  }

// kernel: squeeze.5
= control target key start
LH: loop header
LB: loop body
LE: loop exit
PB: predicated region body
PF: predicated region fallthrough
CT: control target
= control target key end

     0   :  { %vm7_vm0 = vcmask 130048   ;;  %s39_s0 = inlined_call_operand.vmem [shape: f32[32], index: 0, kind: input, shape index: {}]   ;;  %s40_s1 = inlined_call_operand.vmem [shape: f32[2,16], index: 1, kind: output, shape index: {}]  }
   0x1   :  { %v4_v0 = vld [vmem:[%s39_s0] sm:$0x1]  ;;  %s22_s0 = smov 112  }
   0x2   :  { %5 = vst [vmem:[#allocation1] sm:$0x1] %v4_v0 }
   0x9   :  { %v9_v1 = vld [vmem:[#allocation1] sm:$0x1]  }
   0xa   :  { %v6_v2 = vld [vmem:[#allocation1] sm:$0x1]   ;;  %10 = vrot.lane.b32.xlu0 %v9_v1, %s22_s0 }
   0xb   :  { %8 = vst.msk [vmem:[#allocation0] sm:$0x1] %vm7_vm0, %v6_v2  }
  0x7c   :  { %v11_v3 = vpop.permute.xlu0 %10  }
  0x7d   :  { %14 = vst.msk [vmem:[#allocation0 + $0x1] sm:$0x1] %vm7_vm0, %v11_v3  }
  0x84   :  { %v18_v4 = vld [vmem:[#allocation0] sm:$0x3] }
  0x85   :  { %20 = vst [vmem:[%s40_s1] sm:$0x3] %v18_v4 }

// kernel: graftnet_forward.1
= control target key start
LH: loop header
LB: loop body
LE: loop exit
PB: predicated region body
PF: predicated region fallthrough
CT: control target
= control target key end

     0   :  { %v3876_v0 = vmov 0.0   ;;  %vm3877_vm0 = vmmov 0   ;;  %vm182_vm1 = vcmask 523264   ;;  %vm258_vm2 = vcmask 261120   ;;  %s4859_s10 = inlined_call_operand.vmem [shape: bf16[64,32], index: 10, kind: input, shape index: {}]   ;;  %s4860_s3 = inlined_call_operand.vmem [shape: bf16[48,64], index: 3, kind: input, shape index: {}]   ;;  %s4861_s0 = inlined_call_operand.vmem [shape: f32[16,32], index: 0, kind: input, shape index: {}]   ;;  %s4862_s11 = inlined_call_operand.vmem [shape: f32[1,32], index: 11, kind: input, shape index: {}]   ;;  %s4863_s1 = inlined_call_operand.vmem [shape: f32[16,48], index: 1, kind: input, shape index: {}]   ;;  %s4864_s16 = inlined_call_operand.vmem [shape: bf16[2,32,32], index: 16, kind: input, shape index: {}]   ;;  %s4865_s14 = inlined_call_operand.vmem [shape: bf16[2,32,32], index: 14, kind: input, shape index: {}]   ;;  %s4866_s8 = inlined_call_operand.vmem [shape: f32[32,32], index: 8, kind: input, shape index: {}]   ;;  %s4867_s17 = inlined_call_operand.vmem [shape: f32[2,1,32], index: 17, kind: input, shape index: {}]   ;;  %s4868_s4 = inlined_call_operand.vmem [shape: f32[48,32], index: 4, kind: input, shape index: {}]   ;;  %s4869_s7 = inlined_call_operand.vmem [shape: f32[48,2], index: 7, kind: input, shape index: {}]   ;;  %s4870_s9 = inlined_call_operand.vmem [shape: f32[32,1], index: 9, kind: input, shape index: {}]   ;;  %s4871_s5 = inlined_call_operand.vmem [shape: f32[32,48], index: 5, kind: input, shape index: {}]   ;;  %s4872_s18 = inlined_call_operand.vmem [shape: bf16[2,32,32], index: 18, kind: input, shape index: {}]   ;;  %s4873_s15 = inlined_call_operand.vmem [shape: f32[2,1,32], index: 15, kind: input, shape index: {}]   ;;  %s4874_s6 = inlined_call_operand.vmem [shape: f32[32,2], index: 6, kind: input, shape index: {}]   ;;  %s4875_s12 = inlined_call_operand.vmem [shape: bf16[2,32,32], index: 12, kind: input, shape index: {}]   ;;  %s4876_s19 = inlined_call_operand.vmem [shape: f32[2,1,32], index: 19, kind: input, shape index: {}]   ;;  %s4877_s2 = inlined_call_operand.vmem [shape: f32[2,32], index: 2, kind: input, shape index: {}]   ;;  %s4878_s13 = inlined_call_operand.vmem [shape: f32[2,1,32], index: 13, kind: input, shape index: {}]   ;;  %s4879_s22 = inlined_call_operand.vmem [shape: bf16[2,96,32], index: 22, kind: input, shape index: {}]   ;;  %s4880_s20 = inlined_call_operand.vmem [shape: bf16[2,96,32], index: 20, kind: input, shape index: {}]   ;;  %s4881_s23 = inlined_call_operand.vmem [shape: f32[2,1,32], index: 23, kind: input, shape index: {}]   ;;  %s4882_s21 = inlined_call_operand.vmem [shape: f32[2,1,32], index: 21, kind: input, shape index: {}]   ;;  %s4883_s25 = inlined_call_operand.<no memory space> [shape: f32[1,1], index: 25, kind: input, shape index: {}]   ;;  %s4884_s24 = inlined_call_operand.vmem [shape: bf16[1,32], index: 24, kind: input, shape index: {}]   ;;  %s4885_s26 = inlined_call_operand.vmem [shape: f32[1,128], index: 26, kind: output, shape index: {}]  }
   0x1   :  { %4896 = sst [smem:[#allocation3_spill]] %s4859_s10  ;;  %3264 = vmatprep.subr.bf16.mxu0 %v3876_v0  ;;  %3272 = vmatprep.mubr.msk.bf16.mxu0 %vm3877_vm0, %v3876_v0  ;;  %vm4067_vm3 = vmpackc.low %vm258_vm2, %vm258_vm2  ;;  %vm358_vm4 = vcmask 392192   ;;  %vm419_vm5 = vcmask 130048   ;;  %vm569_vm10 = vcmask 15360   ;;  %vm1590_vm13 = vcmask 1040384  }
   0x2   :  { %4897 = sst [smem:[#allocation4_spill]] %s4860_s3  ;;  %vm1727_vm14 = vcmask 785408  }
   0x3   :  { %4898 = sst [smem:[#allocation5_spill]] %s4861_s0 }
   0x4   :  { %4899 = sst [smem:[#allocation6_spill]] %s4862_s11  ;;  %s4907_s11 = sld [smem:[#allocation3_spill]] }
   0x5   :  { %4900 = sst [smem:[#allocation7_spill]] %s4863_s1  ;;  %s4909_s28 = sld [smem:[#allocation5_spill]] }
   0x6   :  { %4901 = sst [smem:[#allocation8_spill]] %s4864_s16  ;;  %s4908_s16 = sld [smem:[#allocation4_spill]] }
   0x7   :  { %4902 = sst [smem:[#allocation9_spill]] %s4865_s14  ;;  %s4914_s27 = sld [smem:[#allocation8_spill]] }
   0x8   :  { %4903 = sst [smem:[#allocation10_spill]] %s4866_s8  ;;  %s4916_s8 = sld [smem:[#allocation9_spill]] }
   0x9   :  { %4904 = sst [smem:[#allocation11_spill]] %s4867_s17  ;;  %s4915_s29 = sld [smem:[#allocation10_spill]] }
   0xa   :  { %4905 = sst [smem:[#allocation12_spill]] %s4868_s4  ;;  %v3799_v1 = vld [vmem:[%s4907_s11] sm:$0xff]   ;;  %v3800_v2 = vld [vmem:[%s4907_s11 + $0x8] sm:$0xff]   ;;  %v3801_v3 = vld [vmem:[%s4907_s11 + $0x10] sm:$0xff]   ;;  %s4910_s4 = sld [smem:[#allocation6_spill]] }
   0xb   :  { %4906 = sst [smem:[#allocation13_spill]] %s4869_s7  ;;  %3265 = vmatpush3.bf16.msra.mxu0 %v3799_v1  ;;  %v3802_v4 = vld [vmem:[%s4907_s11 + $0x18] sm:$0xff]   ;;  %v252_v8 = vld [vmem:[%s4909_s28] sm:$0xff]  ;;  %v253_v9 = vld [vmem:[%s4909_s28 + $0x8] sm:$0xff]  ;;  %s4917_s0 = sld [smem:[#allocation11_spill]] }
   0xc   :  { %3266 = vmatprep.subr.bf16.mxu0 %v3876_v0  ;;  %v3803_v5 = vld [vmem:[%s4908_s16] sm:$0xff]   ;;  %v3804_v6 = vld [vmem:[%s4908_s16 + $0x8] sm:$0xff]   ;;  %v3805_v7 = vld [vmem:[%s4908_s16 + $0x10] sm:$0xff]   ;;  %v254_v10 = vmul.f32 0.17677669, %v252_v8  ;;  %s4913_s16 = sld [smem:[#allocation7_spill]] }
   0xd   :  { %v255_v11 = vmul.f32 0.17677669, %v253_v9  ;;  %v3807_v9 = vld [vmem:[%s4914_s27 + $0x8] sm:$0xff]   ;;  %s4918_s7 = sld [smem:[#allocation12_spill]]  ;;  %s4919_s14 = sld [smem:[#allocation13_spill]] }
   0xe   :  { %3296 = vmatprep.mubr.msk.f32.mxu1 %vm258_vm2, %v254_v10  ;;  %s3879_s28 = smov 64   ;;  %s3880_s17 = smov 32  }
   0xf   :  { %3267 = vmatpush3.bf16.msra.mxu0 %v3800_v2  ;;  %v3643_v12 = vpack.c.bf16 %v255_v11, %v254_v10 }
  0x10   :  { %3268 = vmatprep.subr.bf16.mxu0 %v3876_v0  ;;  %v2934_v13 = vld [vmem:[%s4910_s4] ss:$0 sm:$0xff] }
  0x12   :  { %v257_v36 = vld [vmem:[%s4913_s16 + $0x8] sm:$0xff]  ;;  %v256_v37 = vld [vmem:[%s4913_s16] sm:$0xff] }
  0x13   :  { %3269 = vmatpush3.bf16.msra.mxu0 %v3801_v3 }
  0x14   :  { %3270 = vmatprep.subr.bf16.mxu0 %v3876_v0 }
  0x17   :  { %3271 = vmatpush3.bf16.msra.mxu0 %v3802_v4 }
  0x1a   :  { %3273 = vmatmul.mubr.msk.bf16.vlgmr.msra.gmra.mrb[0].mxu0 %vm182_vm1, %v3803_v5 }
  0x1b   :  { %3276 = vmatprep.mubr.msk.bf16.mxu0 %vm3877_vm0, %v3876_v0 }
  0x22   :  { %3277 = vmatmul.mubr.msk.bf16.gmra.mrb[4].mxu0 %vm182_vm1, %v3804_v6 }
  0x23   :  { %3280 = vmatprep.mubr.msk.bf16.mxu0 %vm3877_vm0, %v3876_v0 }
  0x2a   :  { %3281 = vmatmul.mubr.msk.bf16.gmra.mrb[8].mxu0 %vm182_vm1, %v3805_v7  ;;  %v3806_v7 = vld [vmem:[%s4914_s27] sm:$0xff]  }
  0xed   :  { %v226_v14 = vpop.f32.mrb[0].mxu0 }
  0xee   :  { %v3274_v15 = vpop.f32.mrb[1].mxu0  ;;  %v4061_v17 = vadd.f32 %v2934_v13, %v226_v14  ;;  %v114_v14 = vld [vmem:[%s4915_s29 + $0x8] sm:$0xff] }
  0xef   :  { %v229_v16 = vpop.f32.mrb[2].mxu0 }
  0xf0   :  { %v4063_v18 = vadd.f32 %v2934_v13, %v229_v16  ;;  %v3275_v19 = vpop.f32.mrb[3].mxu0  ;;  %v115_v16 = vld [vmem:[%s4915_s29 + $0x10] sm:$0xff] }
  0xf1   :  { %v116_v19 = vld [vmem:[%s4915_s29 + $0x18] sm:$0xff] }
  0xf2   :  { %v4073_v21 = vpack.c.bf16 %v4063_v18, %v4061_v17 }
  0xf4   :  { %3627 = vmatprep.subr.msk.bf16.mxu1 %vm4067_vm3, %v4073_v21 }
  0xf5   :  { %v234_v22 = vpop.f32.mrb[4].mxu0  ;;  %3630 = vmatpush3.bf16.xpose.msk.msra.mxu1 %vm4067_vm3, %v4073_v21 }
  0xf6   :  { %v3278_v23 = vpop.f32.mrb[5].mxu0  ;;  %v4081_v25 = vadd.f32 %v2934_v13, %v234_v22 }
  0xf7   :  { %v237_v24 = vpop.f32.mrb[6].mxu0  ;;  %v4147_v23 = vpack.c.bf16 %v116_v19, %v115_v16 }
  0xf8   :  { %v4083_v26 = vadd.f32 %v2934_v13, %v237_v24  ;;  %v3279_v27 = vpop.f32.mrb[7].mxu0  ;;  %v4154_v24 = vld [vmem:[%s4916_s8] sm:$0xff]  }
  0xf9   :  { %v4162_v27 = vld [vmem:[%s4916_s8 + $0x8] sm:$0xff]  }
  0xfa   :  { %v4087_v28 = vpack.c.bf16 %v4083_v26, %v4081_v25 }
  0xfc   :  { %3633 = vmatprep.subr.msk.bf16.mxu1 %vm4067_vm3, %v4087_v28 }
  0xfd   :  { %v242_v29 = vpop.f32.mrb[8].mxu0  ;;  %3636 = vmatpush3.bf16.xpose.msk.msra.mxu1 %vm4067_vm3, %v4087_v28 }
  0xfe   :  { %v3282_v30 = vpop.f32.mrb[9].mxu0  ;;  %v4095_v32 = vadd.f32 %v2934_v13, %v242_v29 }
  0xff   :  { %v245_v31 = vpop.f32.mrb[10].mxu0 }
 0x100   :  { %v4097_v33 = vadd.f32 %v2934_v13, %v245_v31  ;;  %v3283_v34 = vpop.f32.mrb[11].mxu0  ;;  %v113_v13 = vld [vmem:[%s4915_s29] sm:$0xff] }
 0x101   :  { %v4144_v20 = vpack.c.bf16 %v114_v14, %v113_v13  ;;  %v110_v14 = vld [vmem:[%s4919_s14 + $0x18] sm:$0xff] }
 0x102   :  { %v4101_v35 = vpack.c.bf16 %v4097_v33, %v4095_v32  ;;  %vm560_vm12 = vcmp.gt.f32.partialorder %v110_v14, 0.0 }
 0x104   :  { %3639 = vmatprep.subr.msk.bf16.mxu1 %vm4067_vm3, %v4101_v35 }
 0x105   :  { %3642 = vmatpush3.bf16.xpose.msk.msra.mxu1 %vm4067_vm3, %v4101_v35 }
 0x106   :  { %3644 = vmatprep.subr.bf16.mxu1 %v3643_v12 }
 0x10c   :  { %3297 = vmatmul.mubr.msk.f32.vlgmr.msra.gmra.mrb[0].mxu1 %vm258_vm2, %v255_v11 }
 0x10d   :  { %3646 = vmatpush3.bf16.msra.mxu1 %v3643_v12 }
 0x10e   :  { %3330 = vmatprep.subr.bf16.mxu1 %v3806_v7 }
 0x1df   :  { %v3298_v38 = vpop.f32.mrb[0].mxu1 }
 0x1e0   :  { %v355_v39 = vadd.f32 %v3298_v38, %v257_v36  ;;  %v349_v40 = vpop.f32.mrb[1].mxu1 }
 0x1e1   :  { %v350_v41 = vadd.f32 %v349_v40, %v256_v37 }
 0x1e2   :  { %v360_v42 = vsel %vm358_vm4, %v355_v39, -inf }
 0x1e3   :  { %v359_v43 = vsel %vm358_vm4, %v350_v41, -inf }
 0x1e4   :  { %v361_v44 = vmax.f32 %v359_v43, %v360_v42 }
 0x1e6   :  { %v362_v45 = vrot.slane %v361_v44, 4 }
 0x1e8   :  { %v363_v46 = vmax.f32 %v361_v44, %v362_v45 }
 0x1ea   :  { %v364_v47 = vrot.slane %v363_v46, 2 }
 0x1ec   :  { %v365_v48 = vmax.f32 %v363_v46, %v364_v47 }
 0x1ee   :  { %v366_v49 = vrot.slane %v365_v48, 1 }
 0x1f0   :  { %v367_v50 = vmax.f32 %v365_v48, %v366_v49 }
 0x1f2   :  { %v368_v51 = vsub.f32 %v350_v41, %v367_v50  ;;  %v369_v52 = vsub.f32 %v355_v39, %v367_v50 }
 0x1f4   :  { %v370_v53 = vmul.f32 1.442695, %v368_v51  ;;  %v372_v54 = vmul.f32 1.442695, %v369_v52 }
 0x1f6   :  { %3840 = vpow2.f32 %v370_v53 }
 0x1f7   :  { %3842 = vpow2.f32 %v372_v54 }
 0x200   :  { %v3841_v55 = vpop.eup %3840 }
 0x201   :  { %v3843_v56 = vpop.eup %3842  ;;  %v374_v57 = vsel %vm358_vm4, %v3841_v55, 0.0 }
 0x202   :  { %v375_v58 = vsel %vm358_vm4, %v3843_v56, 0.0 }
 0x203   :  { %v376_v59 = vadd.f32 %v375_v58, %v374_v57  ;;  %v4218_v58 = vld [vmem:[%s4918_s7 + $0x10] sm:$0xff] }
 0x205   :  { %v377_v60 = vrot.slane %v376_v59, 4 }
 0x207   :  { %v378_v61 = vadd.f32 %v377_v60, %v376_v59  ;;  %v4223_v59 = vld [vmem:[%s4918_s7 + $0x18] sm:$0xff] }
 0x208   :  { %v4227_v60 = vpack.c.bf16 %v4223_v59, %v4218_v58 }
 0x209   :  { %v379_v62 = vrot.slane %v378_v61, 2 }
 0x20b   :  { %v380_v63 = vadd.f32 %v379_v62, %v378_v61  ;;  %v4236_v61 = vld [vmem:[%s4918_s7 + $0x20] sm:$0xff]  ;;  %v4241_v62 = vld [vmem:[%s4918_s7 + $0x28] sm:$0xff] }
 0x20d   :  { %v381_v1 = vrot.slane %v380_v63, 1 }
 0x20f   :  { %v382_v2 = vadd.f32 %v381_v1, %v380_v63  ;;  %v4245_v63 = vpack.c.bf16 %v4241_v62, %v4236_v61 }
 0x211   :  { %v383_v3 = vmax.f32 %v382_v2, 1e-10  ;;  %v112_v2 = vld [vmem:[%s4919_s14 + $0x28] sm:$0xff] }
 0x212   :  { %vm562_vm6 = vcmp.gt.f32.partialorder %v112_v2, 0.0 }
 0x213   :  { %3844 = vrcp.f32 %v383_v3 }
 0x21d   :  { %v3845_v4 = vpop.eup %3844 }
 0x21e   :  { %v385_v5 = vmul.f32 %v3845_v4, %v3841_v55  ;;  %v386_v6 = vmul.f32 %v3845_v4, %v3843_v56  ;;  %v4199_v56 = vld [vmem:[%s4918_s7] sm:$0xff] }
 0x21f   :  { %v111_v4 = vld [vmem:[%s4919_s14 + $0x20] sm:$0xff] }
 0x220   :  { %387 = vxpose.xlu0.b32.start [1/2] (short) (narrow) %v385_v5, 48  ;;  %v108_v5 = vld [vmem:[%s4919_s14 + $0x8] sm:$0xff]  ;;  %vm561_vm7 = vcmp.gt.f32.partialorder %v111_v4, 0.0 }
 0x221   :  { %vm558_vm8 = vcmp.gt.f32.partialorder %v108_v5, 0.0 }
 0x224   :  { %388 = vxpose.xlu0.b32.end [2/2] (short) (narrow) %v386_v6, 48  ;;  %v107_v6 = vld [vmem:[%s4919_s14] sm:$0xff] }
 0x225   :  { %vm557_vm9 = vcmp.gt.f32.partialorder %v107_v6, 0.0 }
 0x2a0   :  { %v403_v8 = vpop.trf.xlu0 }
 0x2a1   :  { %3303 = vmatprep.mubr.msk.f32.mxu1 %vm419_vm5, %v403_v8 }
 0x2a4   :  { %v404_v10 = vpop.trf.xlu0 }
 0x2a5   :  { %3304 = vmatmul.mubr.msk.f32.vlgmr.msra.gmra.mrb[2].mxu1 %vm419_vm5, %v404_v10  ;;  %v109_v10 = vld [vmem:[%s4919_s14 + $0x10] sm:$0xff] }
 0x2a6   :  { %3331 = vmatpush3.bf16.msra.mxu1 %v3806_v7  ;;  %vm559_vm11 = vcmp.gt.f32.partialorder %v109_v10, 0.0 }
 0x2a7   :  { %3332 = vmatprep.subr.bf16.mxu1 %v3807_v9 }
 0x2a8   :  { %v405_v11 = vpop.trf.xlu0 }
 0x2a9   :  { %3306 = vmatprep.mubr.msk.f32.mxu1 %vm419_vm5, %v405_v11 }
 0x2aa   :  { %3333 = vmatpush3.bf16.msra.mxu1 %v3807_v9 }
 0x2ab   :  { %3346 = vmatprep.subr.bf16.mxu1 %v3876_v0 }
 0x2ac   :  { %v406_v12 = vpop.trf.xlu0 }
 0x2ad   :  { %3307 = vmatmul.mubr.msk.f32.gmra.mrb[4].mxu1 %vm419_vm5, %v406_v12 }
 0x2b0   :  { %v407_v15 = vpop.trf.xlu0 }
 0x2b1   :  { %3309 = vmatprep.mubr.msk.f32.mxu1 %vm419_vm5, %v407_v15 }
 0x2b4   :  { %v408_v22 = vpop.trf.xlu0 }
 0x2b5   :  { %3310 = vmatmul.mubr.msk.f32.gmra.mrb[6].mxu1 %vm419_vm5, %v408_v22 }
 0x2b6   :  { %3334 = vmatprep.mubr.msk.bf16.mxu1 %vm258_vm2, %v4144_v20 }
 0x2b9   :  { %3335 = vmatmul.mubr.msk.bf16.vlgmr.msra.gmra.mrb[8].mxu1 %vm258_vm2, %v4147_v23 }
 0x2ba   :  { %3347 = vmatpush3.bf16.msra.mxu1 %v4154_v24  ;;  %3350 = vmatprep.mubr.msk.bf16.mxu1 %vm3877_vm0, %v3876_v0 }
 0x2bb   :  { %3348 = vmatprep.subr.bf16.mxu1 %v3876_v0 }
 0x2be   :  { %3349 = vmatpush3.bf16.msra.mxu1 %v4162_v27 }
 0x2bf   :  { %3362 = vmatprep.subr.bf16.mxu1 %v3876_v0 }
 0x2c1   :  { %3351 = vmatmul.mubr.msk.bf16.vlgmr.msra.gmra.mrb[12].mxu1 %vm258_vm2, %v4073_v21 }
 0x2c2   :  { %3354 = vmatprep.mubr.msk.bf16.mxu1 %vm3877_vm0, %v3876_v0 }
 0x2c9   :  { %3355 = vmatmul.mubr.msk.bf16.gmra.mrb[16].mxu1 %vm258_vm2, %v4087_v28 }
 0x2ca   :  { %3358 = vmatprep.mubr.msk.bf16.mxu1 %vm3877_vm0, %v3876_v0 }
 0x2d1   :  { %3359 = vmatmul.mubr.msk.bf16.gmra.mrb[20].mxu1 %vm258_vm2, %v4101_v35 }
 0x2d2   :  { %3366 = vmatprep.mubr.msk.bf16.mxu1 %vm3877_vm0, %v3876_v0 }
 0x378   :  { %v3305_v29 = vpop.f32.mrb[2].mxu1 }
 0x379   :  { %v534_v30 = vmul.f32 %v3305_v29, %v4063_v18  ;;  %v504_v31 = vpop.f32.mrb[3].mxu1 }
 0x37a   :  { %v533_v34 = vmul.f32 %v504_v31, %v4061_v17  ;;  %v2963_v17 = vld [vmem:[%s4917_s0] ss:$0 sm:$0xff] }
 0x37b   :  { %v542_v36 = vsel %vm258_vm2, %v534_v30, 0.0 }
 0x37c   :  { %543 = vadd.xlane.f32.xlu1 %v542_v36  ;;  %v539_v37 = vsel %vm258_vm2, %v533_v34, 0.0 }
 0x380   :  { %540 = vadd.xlane.f32.xlu1 %v539_v37  ;;  %v3308_v38 = vpop.f32.mrb[4].mxu1 }
 0x381   :  { %v514_v39 = vpop.f32.mrb[5].mxu1  ;;  %v536_v50 = vmul.f32 %v3308_v38, %v4083_v26  ;;  %v4204_v26 = vld [vmem:[%s4918_s7 + $0x8] sm:$0xff] }
 0x382   :  { %v535_v44 = vmul.f32 %v514_v39, %v4081_v25  ;;  %v4209_v57 = vpack.c.bf16 %v4204_v26, %v4199_v56 }
 0x383   :  { %v548_v55 = vsel %vm258_vm2, %v536_v50, 0.0 }
 0x384   :  { %v545_v25 = vsel %vm258_vm2, %v535_v44, 0.0 }
 0x388   :  { %v3311_v40 = vpop.f32.mrb[6].mxu1 }
 0x389   :  { %v538_v41 = vmul.f32 %v3311_v40, %v4097_v33  ;;  %v524_v42 = vpop.f32.mrb[7].mxu1 }
 0x38a   :  { %v537_v43 = vmul.f32 %v524_v42, %v4095_v32 }
 0x38b   :  { %v554_v18 = vsel %vm258_vm2, %v538_v41, 0.0 }
 0x38c   :  { %555 = vadd.xlane.f32.xlu1 %v554_v18  ;;  %v3336_v45 = vpop.f32.mrb[8].mxu1  ;;  %v551_v46 = vsel %vm258_vm2, %v537_v43, 0.0 }
 0x38d   :  { %v877_v47 = vadd.f32 %v3336_v45, %v2963_v17  ;;  %v868_v48 = vpop.f32.mrb[9].mxu1  ;;  %552 = vadd.xlane.f32.xlu0 %v551_v46 }
 0x38e   :  { %v869_v49 = vadd.f32 %v2963_v17, %v868_v48  ;;  %v3337_v33 = vpop.f32.mrb[10].mxu1 }
 0x38f   :  { %v880_v32 = vadd.f32 %v3337_v33, %v2963_v17  ;;  %v871_v51 = vpop.f32.mrb[11].mxu1 }
 0x390   :  { %v872_v52 = vadd.f32 %v2963_v17, %v871_v51  ;;  %546 = vadd.xlane.f32.xlu1 %v545_v25 }
 0x391   :  { %v1017_v53 = vpack.c.bf16 %v880_v32, %v877_v47 }
 0x392   :  { %v1016_v54 = vpack.c.bf16 %v872_v52, %v869_v49 }
 0x394   :  { %549 = vadd.xlane.f32.xlu1 %v548_v55  ;;  %3363 = vmatpush3.bf16.msra.mxu1 %v1016_v54 }
 0x395   :  { %3364 = vmatprep.subr.bf16.mxu1 %v3876_v0 }
 0x398   :  { %3365 = vmatpush3.bf16.msra.mxu1 %v1017_v53 }
 0x39b   :  { %3367 = vmatmul.mubr.msk.bf16.vlgmr.msra.gmra.mrb[12].mxu1 %vm258_vm2, %v4209_v57 }
 0x39c   :  { %3370 = vmatprep.mubr.msk.bf16.mxu1 %vm3877_vm0, %v3876_v0 }
 0x3a3   :  { %3371 = vmatmul.mubr.msk.bf16.gmra.mrb[16].mxu1 %vm258_vm2, %v4227_v60 }
 0x3a4   :  { %3374 = vmatprep.mubr.msk.bf16.mxu1 %vm3877_vm0, %v3876_v0 }
 0x3ab   :  { %3375 = vmatmul.mubr.msk.bf16.gmra.mrb[20].mxu1 %vm258_vm2, %v4245_v63 }
 0x409   :  { %v4249_v1 = vpop.xlane.xlu1 %543 }
 0x40a   :  { %v564_v12 = vsel %vm558_vm8, %v4249_v1, -1e+11 }
 0x40b   :  { %v571_v22 = vsel %vm569_vm10, %v564_v12, -inf }
 0x40d   :  { %v4254_v3 = vpop.xlane.xlu1 %540 }
 0x40e   :  { %v563_v13 = vsel %vm557_vm9, %v4254_v3, -1e+11 }
 0x40f   :  { %v570_v29 = vsel %vm569_vm10, %v563_v13, -inf }
 0x419   :  { %v4265_v7 = vpop.xlane.xlu1 %555 }
 0x41a   :  { %v568_v8 = vsel %vm562_vm6, %v4265_v7, -1e+11  ;;  %v4268_v9 = vpop.xlane.xlu0 %552 }
 0x41b   :  { %v567_v11 = vsel %vm561_vm7, %v4268_v9, -1e+11  ;;  %v576_v15 = vsel %vm569_vm10, %v568_v8, -inf }
 0x41c   :  { %v574_v16 = vsel %vm569_vm10, %v567_v11, -inf  ;;  %v577_v30 = vmax.f32 %v571_v22, %v576_v15 }
 0x41d   :  { %v4281_v19 = vpop.xlane.xlu1 %546  ;;  %v575_v31 = vmax.f32 %v570_v29, %v574_v16 }
 0x41e   :  { %v565_v34 = vsel %vm559_vm11, %v4281_v19, -1e+11 }
 0x41f   :  { %v572_v38 = vsel %vm569_vm10, %v565_v34, -inf  ;;  %v578_v40 = vmax.f32 %v575_v31, %v577_v30 }
 0x421   :  { %v550_v36 = vpop.xlane.xlu1 %549 }
 0x422   :  { %v566_v37 = vsel %vm560_vm12, %v550_v36, -1e+11 }
 0x423   :  { %v573_v39 = vsel %vm569_vm10, %v566_v37, -inf }
 0x424   :  { %v579_v41 = vmax.f32 %v572_v38, %v573_v39 }
 0x426   :  { %v580_v42 = vmax.f32 %v578_v40, %v579_v41 }
 0x428   :  { %v581_v43 = vrot.slane %v580_v42, 4 }
 0x42a   :  { %v582_v44 = vmax.f32 %v580_v42, %v581_v43 }
 0x42c   :  { %v583_v18 = vrot.slane %v582_v44, 2 }
 0x42e   :  { %v584_v17 = vmax.f32 %v582_v44, %v583_v18 }
 0x430   :  { %v585_v45 = vrot.slane %v584_v17, 1 }
 0x432   :  { %v586_v46 = vmax.f32 %v584_v17, %v585_v45 }
 0x434   :  { %v587_v47 = vmul.f32 %v586_v46, %v107_v6  ;;  %v588_v49 = vmul.f32 %v586_v46, %v108_v5  ;;  %v589_v50 = vmul.f32 %v586_v46, %v109_v10  ;;  %v590_v51 = vmul.f32 %v586_v46, %v110_v14 }
 0x435   :  { %v591_v52 = vmul.f32 %v586_v46, %v111_v4  ;;  %v592_v54 = vmul.f32 %v586_v46, %v112_v2 }
 0x436   :  { %v593_v48 = vsel %vm569_vm10, %v587_v47, 0.0  ;;  %v596_v33 = vsel %vm569_vm10, %v588_v49, 0.0  ;;  %v599_v32 = vsel %vm569_vm10, %v589_v50, 0.0  ;;  %v602_v25 = vsel %vm569_vm10, %v590_v51, 0.0 }
 0x437   :  { %594 = vadd.xlane.f32.xlu1 %v593_v48  ;;  %v605_v53 = vsel %vm569_vm10, %v591_v52, 0.0  ;;  %v608_v55 = vsel %vm569_vm10, %v592_v54, 0.0 }
 0x43b   :  { %597 = vadd.xlane.f32.xlu1 %v596_v33 }
 0x43f   :  { %600 = vadd.xlane.f32.xlu1 %v599_v32 }
 0x443   :  { %603 = vadd.xlane.f32.xlu1 %v602_v25 }
 0x447   :  { %606 = vadd.xlane.f32.xlu1 %v605_v53 }
 0x44b   :  { %609 = vadd.xlane.f32.xlu1 %v608_v55 }
 0x46e   :  { %v4294_v5 = vpop.f32.mrb[12].mxu1 }
 0x46f   :  { %v3368_v6 = vpop.f32.mrb[13].mxu1 }
 0x470   :  { %v4296_v8 = vpop.f32.mrb[14].mxu1 }
 0x471   :  { %v3369_v10 = vpop.f32.mrb[15].mxu1 }
 0x476   :  { %v4298_v11 = vpop.f32.mrb[16].mxu1 }
 0x477   :  { %v3372_v12 = vpop.f32.mrb[17].mxu1 }
 0x478   :  { %v4300_v13 = vpop.f32.mrb[18].mxu1 }
 0x479   :  { %v3373_v4 = vpop.f32.mrb[19].mxu1 }
 0x47e   :  { %v4302_v14 = vpop.f32.mrb[20].mxu1  ;;  %629 = vxpose.xlu1.b32.start [1/6] (short) (narrow) %v4199_v56, 32 }
 0x47f   :  { %v3376_v2 = vpop.f32.mrb[21].mxu1 }
 0x480   :  { %v4305_v15 = vpop.f32.mrb[22].mxu1 }
 0x481   :  { %v3377_v16 = vpop.f32.mrb[23].mxu1 }
 0x482   :  { %630 = vxpose.xlu1.b32.cont [2/6] (short) (narrow) %v4204_v26, 32 }
 0x486   :  { %631 = vxpose.xlu1.b32.cont [3/6] (short) (narrow) %v4218_v58, 32 }
 0x48a   :  { %632 = vxpose.xlu1.b32.cont [4/6] (short) (narrow) %v4223_v59, 32 }
 0x48e   :  { %633 = vxpose.xlu1.b32.cont [5/6] (short) (narrow) %v4236_v61, 32 }
 0x492   :  { %634 = vxpose.xlu1.b32.end [6/6] (short) (narrow) %v4241_v62, 32 }
 0x4c4   :  { %v595_v22 = vpop.xlane.xlu1 %594 }
 0x4c5   :  { %v611_v29 = vsub.f32 %v4254_v3, %v595_v22  ;;  %v4370_v22 = vld [vmem:[%s4870_s9 + $0x18] sm:$0xff] }
 0x4c7   :  { %v617_v30 = vmul.f32 1.442695, %v611_v29  ;;  %v4375_v29 = vld [vmem:[%s4870_s9 + $0x10] sm:$0xff] }
 0x4c8   :  { %v598_v31 = vpop.xlane.xlu1 %597 }
 0x4c9   :  { %v612_v34 = vsub.f32 %v4249_v1, %v598_v31  ;;  %3846 = vpow2.f32 %v617_v30 }
 0x4cb   :  { %v619_v37 = vmul.f32 1.442695, %v612_v34 }
 0x4cc   :  { %v601_v38 = vpop.xlane.xlu1 %600 }
 0x4cd   :  { %3848 = vpow2.f32 %v619_v37  ;;  %v613_v39 = vsub.f32 %v4281_v19, %v601_v38 }
 0x4cf   :  { %v621_v40 = vmul.f32 1.442695, %v613_v39  ;;  %v3878_v39 = vmov 0  }
 0x4d0   :  { %v604_v41 = vpop.xlane.xlu1 %603  ;;  %3757 = vset.pattern.permute.xlu0 %v3878_v39  ;;  %3758 = vset.pattern.permute.xlu1 %v3878_v39 }
 0x4d1   :  { %v614_v42 = vsub.f32 %v550_v36, %v604_v41  ;;  %3850 = vpow2.f32 %v621_v40 }
 0x4d3   :  { %v623_v43 = vmul.f32 1.442695, %v614_v42  ;;  %v4316_v3 = vpop.eup %3846  ;;  %v3810_v42 = vld [vmem:[%s4872_s18] sm:$0xff]  }
 0x4d4   :  { %v607_v44 = vpop.xlane.xlu1 %606 }
 0x4d5   :  { %3852 = vpow2.f32 %v623_v43  ;;  %v615_v18 = vsub.f32 %v4268_v9, %v607_v44 }
 0x4d7   :  { %v4318_v17 = vpop.eup %3848  ;;  %v625_v1 = vmul.f32 1.442695, %v615_v18 }
 0x4d8   :  { %v610_v45 = vpop.xlane.xlu1 %609  ;;  %v3647_v46 = vpack.c.bf16 %v4318_v17, %v4316_v3 }
 0x4d9   :  { %v616_v19 = vsub.f32 %v4265_v7, %v610_v45  ;;  %3854 = vpow2.f32 %v625_v1 }
 0x4da   :  { %3648 = vmatprep.subr.bf16.mxu0 %v3647_v46 }
 0x4db   :  { %v627_v47 = vmul.f32 1.442695, %v616_v19  ;;  %3650 = vmatpush3.bf16.msra.mxu0 %v3647_v46  ;;  %v4323_v36 = vpop.eup %3850  ;;  %v3811_v46 = vld [vmem:[%s4872_s18 + $0x8] sm:$0xff]  }
 0x4dd   :  { %3856 = vpow2.f32 %v627_v47 }
 0x4df   :  { %v4325_v48 = vpop.eup %3852 }
 0x4e0   :  { %v3651_v9 = vpack.c.bf16 %v4325_v48, %v4323_v36 }
 0x4e2   :  { %3652 = vmatprep.subr.bf16.mxu0 %v3651_v9 }
 0x4e3   :  { %3654 = vmatpush3.bf16.msra.mxu0 %v3651_v9  ;;  %v4329_v49 = vpop.eup %3854 }
 0x4e7   :  { %v4331_v33 = vpop.eup %3856 }
 0x4e8   :  { %v3655_v7 = vpack.c.bf16 %v4331_v33, %v4329_v49 }
 0x4ea   :  { %3656 = vmatprep.subr.bf16.mxu0 %v3655_v7 }
 0x4eb   :  { %3658 = vmatpush3.bf16.msra.mxu0 %v3655_v7 }
 0x4ec   :  { %3338 = vmatprep.subr.bf16.mxu0 %v4154_v24 }
 0x4fe   :  { %v645_v50 = vpop.trf.xlu1 }
 0x4ff   :  { %3324 = vmatprep.mubr.msk.f32.mxu0 %vm358_vm4, %v645_v50  ;;  %v93_v50 = vld [vmem:[%s4871_s5 + $0x8] sm:$0xff] }
 0x502   :  { %v646_v32 = vpop.trf.xlu1 }
 0x503   :  { %3325 = vmatmul.mubr.msk.f32.vlgmr.msra.gmra.mrb[12].mxu0 %vm358_vm4, %v646_v32  ;;  %v4424_v32 = vld [vmem:[%s4871_s5 + $0x10] sm:$0xff] }
 0x504   :  { %3339 = vmatpush3.bf16.msra.mxu0 %v4154_v24 }
 0x505   :  { %3340 = vmatprep.subr.bf16.mxu0 %v4162_v27 }
 0x506   :  { %v647_v51 = vpop.trf.xlu1 }
 0x507   :  { %3327 = vmatprep.mubr.msk.f32.mxu0 %vm358_vm4, %v647_v51  ;;  %v4432_v51 = vld [vmem:[%s4871_s5 + $0x18] sm:$0xff] }
 0x508   :  { %3341 = vmatpush3.bf16.msra.mxu0 %v4162_v27 }
 0x50a   :  { %v648_v25 = vpop.trf.xlu1 }
 0x50b   :  { %3328 = vmatmul.mubr.msk.f32.gmra.mrb[14].mxu0 %vm358_vm4, %v648_v25  ;;  %v4439_v25 = vld [vmem:[%s4873_s15] ss:$0 sm:$0xff] }
 0x50c   :  { %3342 = vmatprep.mubr.msk.bf16.mxu0 %vm258_vm2, %v4144_v20  ;;  %v4352_v20 = vld [vmem:[%s4870_s9 + $0x8] sm:$0xff] }
 0x50f   :  { %3343 = vmatmul.mubr.msk.bf16.vlgmr.msra.gmra.mrb[16].mxu0 %vm258_vm2, %v4147_v23  ;;  %v4357_v23 = vld [vmem:[%s4870_s9] sm:$0xff] }
 0x510   :  { %3386 = vmatprep.mubr.msk.f32.mxu0 %vm258_vm2, %v4199_v56 }
 0x5d6   :  { %v3326_v24 = vpop.f32.mrb[12].mxu0 }
 0x5d7   :  { %v759_v52 = vmax.f32 %v3326_v24, 1e-10  ;;  %v739_v53 = vpop.f32.mrb[13].mxu0  ;;  %v3701_v24 = vadd.f32 %v4439_v25, %v4294_v5 }
 0x5d8   :  { %v758_v54 = vmax.f32 %v739_v53, 1e-10 }
 0x5d9   :  { %3858 = vrcp.f32 %v759_v52  ;;  %v3702_v52 = vadd.f32 %v4439_v25, %v4296_v8  ;;  %v3705_v8 = vadd.f32 %v4439_v25, %v4302_v14  ;;  %v1514_v14 = vmul.f32 0.2, %v4352_v20 }
 0x5da   :  { %3860 = vrcp.f32 %v758_v54  ;;  %v1090_v54 = vmax.f32 %v3701_v24, 0.0 }
 0x5de   :  { %v3329_v55 = vpop.f32.mrb[14].mxu0 }
 0x5df   :  { %v761_v27 = vmax.f32 %v3329_v55, 1e-10  ;;  %v749_v6 = vpop.f32.mrb[15].mxu0  ;;  %v1091_v55 = vmax.f32 %v3702_v52, 0.0 }
 0x5e0   :  { %v760_v10 = vmax.f32 %v749_v6, 1e-10  ;;  %v3704_v6 = vadd.f32 %v4439_v25, %v4300_v13 }
 0x5e1   :  { %3862 = vrcp.f32 %v761_v27  ;;  %v3703_v27 = vadd.f32 %v4439_v25, %v4298_v11  ;;  %v3706_v11 = vadd.f32 %v4439_v25, %v4305_v15 }
 0x5e2   :  { %3864 = vrcp.f32 %v760_v10 }
 0x5e3   :  { %v4359_v56 = vpop.eup %3858 }
 0x5e4   :  { %v4361_v12 = vpop.eup %3860  ;;  %v1099_v4 = vmul.f32 %v4359_v56, %v4352_v20  ;;  %v4479_v20 = vld [vmem:[%s4874_s6] sm:$0xff] }
 0x5e5   :  { %v1097_v2 = vmul.f32 %v4361_v12, %v4357_v23 }
 0x5e7   :  { %v3659_v16 = vpack.c.bf16 %v1099_v4, %v1097_v2 }
 0x5e9   :  { %3660 = vmatprep.subr.bf16.mxu0 %v3659_v16 }
 0x5ea   :  { %3662 = vmatpush3.bf16.msra.mxu0 %v3659_v16 }
 0x5eb   :  { %v4377_v30 = vpop.eup %3862 }
 0x5ec   :  { %v4379_v31 = vpop.eup %3864  ;;  %v1103_v34 = vmul.f32 %v4377_v30, %v4370_v22 }
 0x5ed   :  { %v1101_v37 = vmul.f32 %v4379_v31, %v4375_v29 }
 0x5ef   :  { %v3663_v38 = vpack.c.bf16 %v1103_v34, %v1101_v37  ;;  %v1092_v34 = vmax.f32 %v3703_v27, 0.0  ;;  %v1093_v37 = vmax.f32 %v3704_v6, 0.0 }
 0x5f1   :  { %3664 = vmatprep.subr.bf16.mxu0 %v3663_v38 }
 0x5f2   :  { %3666 = vmatpush3.bf16.msra.mxu0 %v3663_v38 }
 0x5f3   :  { %3395 = vmatprep.subr.bf16.mxu0 %v3876_v0 }
 0x5f5   :  { %3387 = vmatmul.mubr.msk.f32.vlgmr.msra.gmra.mrb[20].mxu0 %vm258_vm2, %v4204_v26  ;;  %v4401_v26 = vld [vmem:[%s4871_s5] sm:$0xff] }
 0x5f6   :  { %3389 = vmatprep.mubr.msk.f32.mxu0 %vm258_vm2, %v4218_v58  ;;  %3433 = vmatprep.mubr.msk.f32.mxu1 %vm358_vm4, %v4401_v26 }
 0x5f7   :  { %3396 = vmatpush3.bf16.msra.mxu0 %v3810_v42 }
 0x5f8   :  { %3397 = vmatprep.subr.bf16.mxu0 %v3876_v0 }
 0x5f9   :  { %3390 = vmatmul.mubr.msk.f32.gmra.mrb[22].mxu0 %vm258_vm2, %v4223_v59 }
 0x5fa   :  { %3392 = vmatprep.mubr.msk.f32.mxu0 %vm258_vm2, %v4236_v61 }
 0x5fb   :  { %3398 = vmatpush3.bf16.msra.mxu0 %v3811_v46  ;;  %v1516_v46 = vmul.f32 0.2, %v4370_v22 }
 0x5fd   :  { %3393 = vmatmul.mubr.msk.f32.gmra.mrb[24].mxu0 %vm258_vm2, %v4241_v62 }
 0x5fe   :  { %3399 = vmatprep.mubr.msk.bf16.mxu0 %vm3877_vm0, %v3876_v0 }
 0x6c8   :  { %v3388_v58 = vpop.f32.mrb[20].mxu0 }
 0x6c9   :  { %v1218_v59 = vmul.f32 %v4318_v17, %v3388_v58  ;;  %v1188_v61 = vpop.f32.mrb[21].mxu0 }
 0x6ca   :  { %v1217_v62 = vmul.f32 %v4316_v3, %v1188_v61  ;;  %v1094_v61 = vmax.f32 %v3705_v8, 0.0 }
 0x6cc   :  { %v3667_v40 = vpack.c.bf16 %v1218_v59, %v1217_v62  ;;  %1225 = vperm.xlu0 %3757, %v1217_v62   ;;  %v3391_v41 = vpop.f32.mrb[22].mxu0  ;;  %v1095_v62 = vmax.f32 %v3706_v11, 0.0 }
 0x6cd   :  { %v1220_v43 = vmul.f32 %v4325_v48, %v3391_v41  ;;  %v1198_v44 = vpop.f32.mrb[23].mxu0 }
 0x6ce   :  { %v1219_v18 = vmul.f32 %v4323_v36, %v1198_v44  ;;  %3668 = vmatprep.subr.bf16.mxu1 %v3667_v40  ;;  %v4460_v44 = vpack.c.bf16 %v93_v50, %v4401_v26 }
 0x6cf   :  { %3670 = vmatpush3.bf16.msra.mxu1 %v3667_v40 }
 0x6d0   :  { %v3671_v1 = vpack.c.bf16 %v1220_v43, %v1219_v18  ;;  %1230 = vperm.xlu0 %3757, %v1218_v59   ;;  %1235 = vperm.xlu1 %3758, %v1219_v18   ;;  %v3394_v45 = vpop.f32.mrb[24].mxu0 }
 0x6d1   :  { %v1222_v19 = vmul.f32 %v4331_v33, %v3394_v45  ;;  %v1208_v47 = vpop.f32.mrb[25].mxu0 }
 0x6d2   :  { %v1221_v9 = vmul.f32 %v4329_v49, %v1208_v47  ;;  %3672 = vmatprep.subr.bf16.mxu1 %v3671_v1 }
 0x6d3   :  { %3674 = vmatpush3.bf16.msra.mxu1 %v3671_v1 }
 0x6d4   :  { %v3675_v7 = vpack.c.bf16 %v1222_v19, %v1221_v9  ;;  %1240 = vperm.xlu0 %3757, %v1220_v43  }
 0x6d6   :  { %3676 = vmatprep.subr.bf16.mxu1 %v3675_v7 }
 0x6d7   :  { %3678 = vmatpush3.bf16.msra.mxu1 %v3675_v7  ;;  %v4484_v7 = vld [vmem:[%s4874_s6 + $0x8] sm:$0xff] }
 0x6d8   :  { %1245 = vperm.xlu0 %3757, %v1221_v9   ;;  %v4488_v22 = vpack.c.bf16 %v4484_v7, %v4479_v20 }
 0x6da   :  { %3434 = vmatmul.mubr.msk.f32.vlgmr.msra.gmra.mrb[24].mxu1 %vm358_vm4, %v93_v50  ;;  %v2985_v50 = vld [vmem:[%s4876_s19] ss:$0 sm:$0xff] }
 0x6db   :  { %3436 = vmatprep.mubr.msk.f32.mxu1 %vm358_vm4, %v4424_v32 }
 0x6dc   :  { %1250 = vperm.xlu0 %3757, %v1222_v19  }
 0x6de   :  { %3437 = vmatmul.mubr.msk.f32.gmra.mrb[26].mxu1 %vm358_vm4, %v4432_v51 }
 0x6df   :  { %3449 = vmatprep.mubr.msk.bf16.mxu1 %vm569_vm10, %v4488_v22 }
 0x74b   :  { %v1226_v53 = vpop.permute.xlu0 %1225 }
 0x74c   :  { %v1253_v4 = vmul.f32 %v1226_v53, %v1090_v54 }
 0x74f   :  { %v1231_v10 = vpop.permute.xlu0 %1230  ;;  %v1236_v16 = vpop.permute.xlu1 %1235 }
 0x750   :  { %v1254_v2 = vmul.f32 %v1231_v10, %v1091_v55  ;;  %v1255_v39 = vmul.f32 %v1236_v16, %v1092_v34 }
 0x752   :  { %v1259_v38 = vpack.c.bf16 %v1254_v2, %v1253_v4 }
 0x753   :  { %v1241_v5 = vpop.permute.xlu0 %1240 }
 0x754   :  { %v1256_v58 = vmul.f32 %v1241_v5, %v1093_v37  ;;  %3400 = vmatmul.mubr.msk.bf16.vlgmr.msra.gmra.mrb[28].mxu0 %vm258_vm2, %v1259_v38 }
 0x755   :  { %3403 = vmatprep.mubr.msk.bf16.mxu0 %vm3877_vm0, %v3876_v0 }
 0x756   :  { %v1260_v13 = vpack.c.bf16 %v1256_v58, %v1255_v39 }
 0x757   :  { %v1246_v59 = vpop.permute.xlu0 %1245 }
 0x758   :  { %v1257_v41 = vmul.f32 %v1246_v59, %v1094_v61  ;;  %v4498_v61 = vpack.c.bf16 %v4432_v51, %v4424_v32  ;;  %v121_v32 = vld [vmem:[%s4877_s2] sm:$0x3] }
 0x759   :  { %v1521_v51 = vpack.c.bf16 %v121_v32, %v121_v32  ;;  %v3823_v32 = vld [vmem:[%s4880_s20 + $0x20] sm:$0xff]  }
 0x75b   :  { %v1251_v40 = vpop.permute.xlu0 %1250 }
 0x75c   :  { %v1258_v42 = vmul.f32 %v1251_v40, %v1095_v62  ;;  %3404 = vmatmul.mubr.msk.bf16.gmra.mrb[32].mxu0 %vm258_vm2, %v1260_v13  ;;  %v3812_v62 = vld [vmem:[%s4875_s12] sm:$0xff]   ;;  %v3813_v40 = vld [vmem:[%s4875_s12 + $0x8] sm:$0xff]  }
 0x75d   :  { %3407 = vmatprep.mubr.msk.bf16.mxu0 %vm3877_vm0, %v3876_v0 }
 0x75e   :  { %v1261_v43 = vpack.c.bf16 %v1258_v42, %v1257_v41 }
 0x764   :  { %3408 = vmatmul.mubr.msk.bf16.gmra.mrb[36].mxu0 %vm258_vm2, %v1261_v43 }
 0x765   :  { %3417 = vmatprep.mubr.msk.bf16.mxu0 %vm358_vm4, %v4460_v44 }
 0x7ad   :  { %v3435_v15 = vpop.f32.mrb[24].mxu1 }
 0x7ae   :  { %v1510_v18 = vmul.f32 0.8, %v3435_v15  ;;  %v4466_v1 = vpop.f32.mrb[25].mxu1 }
 0x7b0   :  { %v4468_v45 = vadd.f32 %v1514_v14, %v1510_v18 }
 0x7b1   :  { %v3438_v19 = vpop.f32.mrb[26].mxu1 }
 0x7b2   :  { %v1512_v47 = vmul.f32 0.8, %v3438_v19  ;;  %1885 = vperm.xlu1 %3758, %v4468_v45   ;;  %v4472_v26 = vpop.f32.mrb[27].mxu1 }
 0x7b4   :  { %v4474_v9 = vadd.f32 %v1516_v46, %v1512_v47 }
 0x7b6   :  { %1895 = vperm.xlu1 %3758, %v4474_v9  }
 0x827   :  { %v1323_v24 = vpop.f32.mrb[28].mxu0 }
 0x828   :  { %v3401_v52 = vpop.f32.mrb[29].mxu0  ;;  %v1324_v54 = vadd.f32 %v2985_v50, %v1323_v24 }
 0x829   :  { %v1326_v53 = vpop.f32.mrb[30].mxu0 }
 0x82a   :  { %v1327_v55 = vadd.f32 %v2985_v50, %v1326_v53  ;;  %v3402_v27 = vpop.f32.mrb[31].mxu0  ;;  %v2997_v53 = vld [vmem:[%s4878_s13] ss:$0 sm:$0xff] }
 0x82c   :  { %v1346_v6 = vpack.c.bf16 %v1327_v55, %v1324_v54 }
 0x82e   :  { %3411 = vmatprep.subr.bf16.mxu0 %v1346_v6 }
 0x82f   :  { %v1331_v10 = vpop.f32.mrb[32].mxu0  ;;  %3412 = vmatpush3.bf16.msra.mxu0 %v1346_v6 }
 0x830   :  { %v3405_v4 = vpop.f32.mrb[33].mxu0  ;;  %v1332_v16 = vadd.f32 %v2985_v50, %v1331_v10 }
 0x831   :  { %v1334_v2 = vpop.f32.mrb[34].mxu0  ;;  %v4528_v4 = vld [vmem:[%s4874_s6 + $0x10] sm:$0xff] }
 0x832   :  { %v1335_v34 = vadd.f32 %v2985_v50, %v1334_v2  ;;  %v3406_v37 = vpop.f32.mrb[35].mxu0 }
 0x834   :  { %v1347_v38 = vpack.c.bf16 %v1335_v34, %v1332_v16  ;;  %v4534_v34 = vld [vmem:[%s4874_s6 + $0x18] sm:$0xff] }
 0x835   :  { %v4538_v37 = vpack.c.bf16 %v4534_v34, %v4528_v4 }
 0x836   :  { %3413 = vmatprep.subr.bf16.mxu0 %v1347_v38 }
 0x837   :  { %v1339_v5 = vpop.f32.mrb[36].mxu0  ;;  %3414 = vmatpush3.bf16.msra.mxu0 %v1347_v38 }
 0x838   :  { %v3409_v39 = vpop.f32.mrb[37].mxu0  ;;  %v1340_v8 = vadd.f32 %v2985_v50, %v1339_v5  ;;  %v3814_v5 = vld [vmem:[%s4879_s22] sm:$0xff]  }
 0x839   :  { %v1342_v58 = vpop.f32.mrb[38].mxu0  ;;  %v3815_v39 = vld [vmem:[%s4880_s20] sm:$0xff]  }
 0x83a   :  { %v1343_v11 = vadd.f32 %v2985_v50, %v1342_v58  ;;  %v3410_v13 = vpop.f32.mrb[39].mxu0  ;;  %v3816_v58 = vld [vmem:[%s4879_s22 + $0x8] sm:$0xff]  }
 0x83b   :  { %v3819_v13 = vld [vmem:[%s4880_s20 + $0x10] sm:$0xff]  }
 0x83c   :  { %v1348_v59 = vpack.c.bf16 %v1343_v11, %v1340_v8  ;;  %v3817_v8 = vld [vmem:[%s4880_s20 + $0x8] sm:$0xff]   ;;  %v3818_v11 = vld [vmem:[%s4879_s22 + $0x10] sm:$0xff]  }
 0x83e   :  { %3415 = vmatprep.subr.bf16.mxu0 %v1348_v59 }
 0x83f   :  { %3416 = vmatpush3.bf16.msra.mxu0 %v1348_v59  ;;  %v3820_v59 = vld [vmem:[%s4879_s22 + $0x18] sm:$0xff]  }
 0x840   :  { %3439 = vmatprep.subr.bf16.mxu0 %v3876_v0 }
 0x842   :  { %3418 = vmatmul.mubr.msk.bf16.vlgmr.msra.gmra.mrb[16].mxu0 %vm358_vm4, %v4498_v61 }
 0x843   :  { %3440 = vmatpush3.bf16.msra.mxu0 %v3812_v62  ;;  %3443 = vmatprep.mubr.msk.bf16.mxu0 %vm3877_vm0, %v3876_v0  ;;  %v3821_v62 = vld [vmem:[%s4880_s20 + $0x18] sm:$0xff]  }
 0x844   :  { %3441 = vmatprep.subr.bf16.mxu0 %v3876_v0 }
 0x847   :  { %3442 = vmatpush3.bf16.msra.mxu0 %v3813_v40  ;;  %v3822_v40 = vld [vmem:[%s4879_s22 + $0x20] sm:$0xff]  }
 0x848   :  { %3453 = vmatprep.subr.bf16.mxu0 %v3814_v5 }
 0x84a   :  { %3444 = vmatmul.mubr.msk.bf16.vlgmr.msra.gmra.mrb[40].mxu0 %vm258_vm2, %v1521_v51 }
 0x84b   :  { %3454 = vmatpush3.bf16.msra.mxu0 %v3814_v5 }
 0x84c   :  { %3455 = vmatprep.subr.bf16.mxu0 %v3816_v58 }
 0x84f   :  { %3456 = vmatpush3.bf16.msra.mxu0 %v3816_v58 }
 0x850   :  { %3457 = vmatprep.subr.bf16.mxu0 %v3818_v11 }
 0x853   :  { %3458 = vmatpush3.bf16.msra.mxu0 %v3818_v11 }
 0x854   :  { %3459 = vmatprep.subr.bf16.mxu0 %v3820_v59 }
 0x857   :  { %3460 = vmatpush3.bf16.msra.mxu0 %v3820_v59  ;;  %v3868_v59 = vld [vmem:[%s4915_s29 + $0x18] sm:$0xff] }
 0x858   :  { %3461 = vmatprep.subr.bf16.mxu0 %v3822_v40 }
 0x85b   :  { %3462 = vmatpush3.bf16.msra.mxu0 %v3822_v40  ;;  %v3869_v40 = vld [vmem:[%s4915_s29 + $0x10] sm:$0xff] }
 0x915   :  { %v3419_v41 = vpop.f32.mrb[16].mxu0 }
 0x916   :  { %v3697_v42 = vadd.f32 %v3419_v41, %v4439_v25  ;;  %v1389_v43 = vpop.f32.mrb[17].mxu0  ;;  %v3824_v41 = vld [vmem:[%s4879_s22 + $0x28] sm:$0xff]  }
 0x917   :  { %v3698_v14 = vadd.f32 %v4439_v25, %v1389_v43  ;;  %v3420_v15 = vpop.f32.mrb[18].mxu0  ;;  %3463 = vmatprep.subr.bf16.mxu0 %v3824_v41 }
 0x918   :  { %v3699_v18 = vadd.f32 %v3420_v15, %v4439_v25  ;;  %v1392_v46 = vpop.f32.mrb[19].mxu0  ;;  %v1410_v47 = vmax.f32 %v3697_v42, 0.0  ;;  %v3825_v42 = vld [vmem:[%s4880_s20 + $0x28] sm:$0xff]   ;;  %3464 = vmatpush3.bf16.msra.mxu0 %v3824_v41 }
 0x919   :  { %v3700_v19 = vadd.f32 %v4439_v25, %v1392_v46  ;;  %v1408_v24 = vmax.f32 %v3698_v14, 0.0 }
 0x91a   :  { %v1411_v50 = vmax.f32 %v3699_v18, 0.0 }
 0x91b   :  { %v1409_v52 = vmax.f32 %v3700_v19, 0.0  ;;  %v1509_v19 = vmul.f32 0.8, %v4466_v1 }
 0x91c   :  { %v4523_v54 = vpack.i.bf16 %v1411_v50, %v1410_v47  ;;  %v1513_v47 = vmul.f32 0.2, %v4357_v23 }
 0x91d   :  { %v3759_v55 = vpack.i.bf16 %v1409_v52, %v1408_v24  ;;  %v1577_v27 = vpop.f32.mrb[40].mxu0  ;;  %v1511_v24 = vmul.f32 0.8, %v4472_v26  ;;  %v1515_v52 = vmul.f32 0.2, %v4375_v29  ;;  %v3866_v26 = vld [vmem:[%s4915_s29 + $0x8] sm:$0xff] }
 0x91e   :  { %v1578_v6 = vadd.f32 %v2997_v53, %v1577_v27  ;;  %v3445_v10 = vpop.f32.mrb[41].mxu0  ;;  %v4586_v50 = vadd.f32 %v1513_v47, %v1509_v19 }
 0x91f   :  { %v1580_v25 = vpop.f32.mrb[42].mxu0  ;;  %3760 = vrot.lane.b32.xlu0 %v3759_v55, %s3879_s28  ;;  %v4591_v53 = vadd.f32 %v1515_v52, %v1511_v24  ;;  %v3826_v52 = vld [vmem:[%s4914_s27 + $0x10] sm:$0xff]  }
 0x920   :  { %v1583_v2 = vpack.c.bf16 %v1578_v6, %v1578_v6  ;;  %v3446_v16 = vpop.f32.mrb[43].mxu0 }
 0x921   :  { %v3867_v16 = vld [vmem:[%s4915_s29] sm:$0xff] }
 0x922   :  { %v1592_v38 = vsel %vm1590_vm13, %v1583_v2, 0  ;;  %3749 = vmatprep.subr.msk.bf16.mxu1 %vm1590_vm13, %v1583_v2 }
 0x923   :  { %3448 = vmatpush3.bf16.msra.mxu1 %v1592_v38 }
 0x924   :  { %3469 = vmatprep.subr.bf16.mxu1 %v3815_v39 }
 0x926   :  { %3450 = vmatmul.mubr.msk.bf16.vlgmr.msra.gmra.mrb[28].mxu1 %vm569_vm10, %v4538_v37 }
 0x927   :  { %3470 = vmatpush3.bf16.msra.mxu1 %v3815_v39 }
 0x928   :  { %3471 = vmatprep.subr.bf16.mxu1 %v3817_v8 }
 0x92b   :  { %3472 = vmatpush3.bf16.msra.mxu1 %v3817_v8 }
 0x92c   :  { %3473 = vmatprep.subr.bf16.mxu1 %v3819_v13 }
 0x92f   :  { %3474 = vmatpush3.bf16.msra.mxu1 %v3819_v13 }
 0x930   :  { %3475 = vmatprep.subr.bf16.mxu1 %v3821_v62 }
 0x933   :  { %3476 = vmatpush3.bf16.msra.mxu1 %v3821_v62 }
 0x934   :  { %3477 = vmatprep.subr.bf16.mxu1 %v3823_v32 }
 0x937   :  { %3478 = vmatpush3.bf16.msra.mxu1 %v3823_v32 }
 0x938   :  { %3479 = vmatprep.subr.bf16.mxu1 %v3825_v42 }
 0x93b   :  { %3480 = vmatpush3.bf16.msra.mxu1 %v3825_v42 }
 0x93c   :  { %3496 = vmatprep.subr.bf16.mxu1 %v3826_v52 }
 0x991   :  { %v3761_v55 = vpop.permute.xlu0 %3760 }
 0x992   :  { %v3763_v10 = vunpack.i.h.bf16 %v3761_v55  ;;  %v3762_v25 = vunpack.i.l.bf16 %v3761_v55 }
 0x9f9   :  { %v3451_v51 = vpop.f32.mrb[28].mxu1 }
 0x9fa   :  { %v1628_v43 = vpop.f32.mrb[29].mxu1 }
 0x9fb   :  { %v3452_v14 = vpop.f32.mrb[30].mxu1 }
 0x9fc   :  { %v3764_v15 = vpack.i.bf16 %v3452_v14, %v3451_v51  ;;  %v1631_v18 = vpop.f32.mrb[31].mxu1 }
 0x9fd   :  { %v3769_v46 = vpack.i.bf16 %v1631_v18, %v1628_v43 }
 0x9fe   :  { %3765 = vrot.lane.b32.xlu0 %v3764_v15, %s3880_s17  ;;  %v1886_v15 = vpop.permute.xlu1 %1885 }
 0x9ff   :  { %v1899_v18 = vmul.f32 %v1886_v15, %v4484_v7  ;;  %v3881_v7 = vmov 0.0|0.0   ;;  %v2320_v15 = vmul.f32 %v4361_v12, %v4586_v50  ;;  %v3870_v12 = vld [vmem:[%s4918_s7] sm:$0xff] }
 0xa00   :  { %3679 = vmatprep.subr.bf16.mxu0 %v3881_v7 }
 0xa02   :  { %3770 = vrot.lane.b32.xlu0 %v3769_v46, %s3880_s17  ;;  %v1896_v47 = vpop.permute.xlu1 %1895 }
 0xa03   :  { %v1901_v24 = vmul.f32 %v1896_v47, %v4534_v34 }
 0xa06   :  { %3775 = vrot.lane.b32.xlu0 %v4523_v54, %s3879_s28 }
 0xa0a   :  { %1880 = vperm.xlu0 %3757, %v4586_v50  }
 0xa0e   :  { %1890 = vperm.xlu0 %3757, %v4591_v53  }
 0xa70   :  { %v3766_v27 = vpop.permute.xlu0 %3765 }
 0xa71   :  { %v3768_v54 = vunpack.i.h.bf16 %v3766_v27  ;;  %v3767_v2 = vunpack.i.l.bf16 %v3766_v27  ;;  %v3012_v27 = vld [vmem:[%s4882_s21] ss:$0 sm:$0xff] }
 0xa73   :  { %v1678_v62 = vsel %vm258_vm2, %v3868_v59, %v3768_v54  ;;  %v1677_v32 = vsel %vm258_vm2, %v3869_v40, %v3767_v2 }
 0xa74   :  { %v3771_v1 = vpop.permute.xlu0 %3770 }
 0xa75   :  { %v3773_v6 = vunpack.i.h.bf16 %v3771_v1  ;;  %v3772_v23 = vunpack.i.l.bf16 %v3771_v1 }
 0xa77   :  { %v1676_v29 = vsel %vm258_vm2, %v3866_v26, %v3773_v6  ;;  %v1675_v38 = vsel %vm258_vm2, %v3867_v16, %v3772_v23 }
 0xa78   :  { %v3776_v5 = vpop.permute.xlu0 %3775  ;;  %v1679_v39 = vsel %vm182_vm1, %v1675_v38, %v3762_v25  ;;  %v1680_v58 = vsel %vm182_vm1, %v1676_v29, %v3763_v10 }
 0xa79   :  { %v3778_v8 = vunpack.i.h.bf16 %v3776_v5  ;;  %v3777_v11 = vunpack.i.l.bf16 %v3776_v5  ;;  %v1683_v13 = vpack.c.bf16 %v1680_v58, %v1679_v39 }
 0xa7b   :  { %v1682_v51 = vsel %vm182_vm1, %v1678_v62, %v3778_v8  ;;  %v1681_v41 = vsel %vm182_vm1, %v1677_v32, %v3777_v11  ;;  %3465 = vmatprep.mubr.msk.bf16.mxu0 %vm1727_vm14, %v1683_v13  ;;  %3481 = vmatprep.mubr.msk.bf16.mxu1 %vm1727_vm14, %v1683_v13 }
 0xa7c   :  { %v1684_v42 = vpack.c.bf16 %v1682_v51, %v1681_v41  ;;  %v3828_v51 = vld [vmem:[%s4916_s8 + $0x10] sm:$0xff]  }
 0xa7e   :  { %3466 = vmatmul.mubr.msk.bf16.vlgmr.msra.gmra.mrb[44].mxu0 %vm1727_vm14, %v1684_v42  ;;  %3482 = vmatmul.mubr.msk.bf16.vlgmr.msra.gmra.mrb[32].mxu1 %vm1727_vm14, %v1684_v42 }
 0xa7f   :  { %3493 = vmatprep.mubr.msk.f32.mxu0 %vm3877_vm0, %v3876_v0  ;;  %3497 = vmatpush3.bf16.msra.mxu1 %v3826_v52 }
 0xa89   :  { %v1881_v43 = vpop.permute.xlu0 %1880 }
 0xa8a   :  { %v1898_v14 = vmul.f32 %v1881_v43, %v4479_v20  ;;  %v3827_v20 = vld [vmem:[%s4914_s27 + $0x18] sm:$0xff]  }
 0xa8b   :  { %3498 = vmatprep.subr.bf16.mxu1 %v3827_v20  ;;  %v3829_v43 = vld [vmem:[%s4916_s8 + $0x18] sm:$0xff]  }
 0xa8c   :  { %1902 = vxpose.xlu0.b32.start [1/4] (short) (narrow) %v1898_v14, 8  ;;  %3499 = vmatpush3.bf16.msra.mxu1 %v3827_v20  ;;  %v2321_v14 = vmul.f32 %v4359_v56, %v4468_v45  ;;  %v3055_v45 = vld [vmem:[%s4917_s0 + $0x1] ss:$0 sm:$0xff] }
 0xa8d   :  { %v1891_v46 = vpop.permute.xlu0 %1890  ;;  %3512 = vmatprep.subr.bf16.mxu1 %v3876_v0 }
 0xa8e   :  { %v1900_v19 = vmul.f32 %v1891_v46, %v4528_v4  ;;  %v3003_v4 = vld [vmem:[%s4881_s23] ss:$0 sm:$0xff]  ;;  %v2323_v46 = vmul.f32 %v4377_v30, %v4474_v9  ;;  %v3872_v30 = vld [vmem:[%s4918_s7 + $0x10] sm:$0xff] }
 0xa90   :  { %1903 = vxpose.xlu0.b32.cont [2/4] (short) (narrow) %v1899_v18, 8  ;;  %v3685_v18 = vpack.c.bf16 %v2321_v14, %v2320_v15 }
 0xa94   :  { %1904 = vxpose.xlu0.b32.cont [3/4] (short) (narrow) %v1900_v19, 8  ;;  %v2322_v19 = vmul.f32 %v4379_v31, %v4591_v53 }
 0xa96   :  { %v3689_v56 = vpack.c.bf16 %v2323_v46, %v2322_v19 }
 0xa98   :  { %1905 = vxpose.xlu0.b32.end [4/4] (short) (narrow) %v1901_v24, 8 }
 0xb0c   :  { %v1918_v42 = vpop.trf.xlu0 }
 0xb51   :  { %v3467_v34 = vpop.f32.mrb[44].mxu0  ;;  %v3483_v55 = vpop.f32.mrb[32].mxu1 }
 0xb52   :  { %v1768_v1 = vpop.f32.mrb[45].mxu0  ;;  %v1863_v6 = vpop.f32.mrb[33].mxu1  ;;  %v4639_v54 = vadd.f32 %v3467_v34, %v3003_v4  ;;  %v1872_v2 = vadd.f32 %v3483_v55, %v3012_v27 }
 0xb53   :  { %v4637_v23 = vadd.f32 %v3003_v4, %v1768_v1  ;;  %v3468_v10 = vpop.f32.mrb[46].mxu0  ;;  %v3484_v25 = vpop.f32.mrb[34].mxu1  ;;  %v1864_v5 = vadd.f32 %v3012_v27, %v1863_v6 }
 0xb54   :  { %v4641_v26 = vadd.f32 %v3468_v10, %v3003_v4  ;;  %v1875_v29 = vadd.f32 %v3484_v25, %v3012_v27  ;;  %v1771_v16 = vpop.f32.mrb[47].mxu0  ;;  %v1866_v38 = vpop.f32.mrb[35].mxu1  ;;  %v1785_v40 = vmax.f32 %v4639_v54, 0.0 }
 0xb55   :  { %v4643_v39 = vadd.f32 %v3003_v4, %v1771_v16  ;;  %v1867_v58 = vadd.f32 %v3012_v27, %v1866_v38  ;;  %v1783_v13 = vmax.f32 %v4637_v23, 0.0 }
 0xb56   :  { %v1786_v8 = vmax.f32 %v4641_v26, 0.0  ;;  %v3683_v11 = vpack.c.bf16 %v1875_v29, %v1872_v2  ;;  %v4751_v2 = vld [vmem:[%s4873_s15 + $0x1] ss:$0 sm:$0xff] }
 0xb57   :  { %v1784_v59 = vmax.f32 %v4643_v39, 0.0  ;;  %v3680_v62 = vpack.c.bf16 %v1867_v58, %v1864_v5 }
 0xb58   :  { %v2051_v41 = vpack.c.bf16 %v1786_v8, %v1785_v40 }
 0xb59   :  { %v2050_v32 = vpack.c.bf16 %v1784_v59, %v1783_v13  ;;  %3681 = vmatpush3.bf16.msra.mxu0 %v3680_v62 }
 0xb5a   :  { %3682 = vmatprep.subr.bf16.mxu0 %v3881_v7 }
 0xb5b   :  { %3500 = vmatprep.mubr.msk.bf16.mxu1 %vm258_vm2, %v2050_v32 }
 0xb5c   :  { %3501 = vmatmul.mubr.msk.bf16.vlgmr.msra.gmra.mrb[36].mxu1 %vm258_vm2, %v2051_v41 }
 0xb5d   :  { %3684 = vmatpush3.bf16.msra.mxu0 %v3683_v11  ;;  %3513 = vmatpush3.bf16.msra.mxu1 %v3828_v51 }
 0xb5e   :  { %3504 = vmatprep.subr.bf16.mxu0 %v3828_v51  ;;  %3514 = vmatprep.subr.bf16.mxu1 %v3876_v0 }
 0xb5f   :  { %3516 = vmatprep.mubr.msk.bf16.mxu1 %vm3877_vm0, %v3876_v0 }
 0xb60   :  { %3494 = vmatmul.mubr.msk.f32.vlgmr.msra.gmra.mrb[26].mxu0 %vm258_vm2, %v1918_v42 }
 0xb61   :  { %3505 = vmatpush3.bf16.msra.mxu0 %v3828_v51  ;;  %3508 = vmatprep.mubr.msk.bf16.mxu0 %vm258_vm2, %v2050_v32 }
 0xb62   :  { %3515 = vmatpush3.bf16.msra.mxu1 %v3829_v43  ;;  %3506 = vmatprep.subr.bf16.mxu0 %v3829_v43 }
 0xb63   :  { %3528 = vmatprep.subr.bf16.mxu1 %v3876_v0 }
 0xb65   :  { %3517 = vmatmul.mubr.msk.bf16.vlgmr.msra.gmra.mrb[40].mxu1 %vm258_vm2, %v4073_v21  ;;  %3507 = vmatpush3.bf16.msra.mxu0 %v3829_v43  ;;  %v3871_v21 = vld [vmem:[%s4918_s7 + $0x8] sm:$0xff] }
 0xb66   :  { %3686 = vmatprep.subr.bf16.mxu0 %v3685_v18  ;;  %3520 = vmatprep.mubr.msk.bf16.mxu1 %vm3877_vm0, %v3876_v0 }
 0xb68   :  { %3509 = vmatmul.mubr.msk.bf16.vlgmr.msra.gmra.mrb[48].mxu0 %vm258_vm2, %v2051_v41 }
 0xb69   :  { %3688 = vmatpush3.bf16.msra.mxu0 %v3685_v18  ;;  %3552 = vmatprep.mubr.msk.f32.mxu0 %vm258_vm2, %v3870_v12 }
 0xb6a   :  { %3690 = vmatprep.subr.bf16.mxu0 %v3689_v56 }
 0xb6d   :  { %3521 = vmatmul.mubr.msk.bf16.gmra.mrb[44].mxu1 %vm258_vm2, %v4087_v28  ;;  %3692 = vmatpush3.bf16.msra.mxu0 %v3689_v56  ;;  %v3873_v28 = vld [vmem:[%s4918_s7 + $0x18] sm:$0xff] }
 0xb6e   :  { %3524 = vmatprep.mubr.msk.bf16.mxu1 %vm3877_vm0, %v3876_v0  ;;  %3561 = vmatprep.subr.bf16.mxu0 %v3876_v0 }
 0xb70   :  { %3553 = vmatmul.mubr.msk.f32.vlgmr.msra.gmra.mrb[52].mxu0 %vm258_vm2, %v3871_v21 }
 0xb71   :  { %3555 = vmatprep.mubr.msk.f32.mxu0 %vm258_vm2, %v3872_v30 }
 0xb74   :  { %3556 = vmatmul.mubr.msk.f32.gmra.mrb[54].mxu0 %vm258_vm2, %v3873_v28 }
 0xb75   :  { %3525 = vmatmul.mubr.msk.bf16.gmra.mrb[48].mxu1 %vm258_vm2, %v4101_v35  ;;  %3565 = vmatprep.mubr.msk.bf16.mxu0 %vm3877_vm0, %v3876_v0 }
 0xb76   :  { %3532 = vmatprep.mubr.msk.bf16.mxu1 %vm3877_vm0, %v3876_v0 }
 0xc2f   :  { %v3502_v31 = vpop.f32.mrb[36].mxu1 }
 0xc30   :  { %v2110_v9 = vpop.f32.mrb[37].mxu1  ;;  %v2119_v53 = vadd.f32 %v3502_v31, %v3055_v45 }
 0xc31   :  { %v3503_v50 = vpop.f32.mrb[38].mxu1  ;;  %v2111_v52 = vadd.f32 %v3055_v45, %v2110_v9 }
 0xc32   :  { %v2122_v47 = vadd.f32 %v3503_v50, %v3055_v45  ;;  %v2113_v24 = vpop.f32.mrb[39].mxu1 }
 0xc33   :  { %v2114_v20 = vadd.f32 %v3055_v45, %v2113_v24  ;;  %v4714_v7 = vpop.f32.mrb[26].mxu0 }
 0xc34   :  { %v2250_v35 = vpack.c.bf16 %v2122_v47, %v2119_v53  ;;  %v3495_v4 = vpop.f32.mrb[27].mxu0 }
 0xc35   :  { %v2249_v34 = vpack.c.bf16 %v2114_v20, %v2111_v52 }
 0xc37   :  { %3529 = vmatpush3.bf16.msra.mxu1 %v2249_v34 }
 0xc38   :  { %3530 = vmatprep.subr.bf16.mxu1 %v3876_v0 }
 0xc3b   :  { %3531 = vmatpush3.bf16.msra.mxu1 %v2250_v35 }
 0xc3c   :  { %3693 = vmatprep.subr.bf16.mxu1 %v3685_v18 }
 0xc3e   :  { %3533 = vmatmul.mubr.msk.bf16.vlgmr.msra.gmra.mrb[40].mxu1 %vm258_vm2, %v4209_v57 }
 0xc3f   :  { %3695 = vmatpush3.bf16.msra.mxu1 %v3685_v18  ;;  %3536 = vmatprep.mubr.msk.bf16.mxu1 %vm3877_vm0, %v3876_v0 }
 0xc40   :  { %3694 = vmatprep.subr.bf16.mxu1 %v3689_v56 }
 0xc43   :  { %3696 = vmatpush3.bf16.msra.mxu1 %v3689_v56  ;;  %v3554_v55 = vpop.f32.mrb[52].mxu0 }
 0xc44   :  { %v2420_v27 = vmul.f32 %v4318_v17, %v3554_v55  ;;  %v2390_v1 = vpop.f32.mrb[53].mxu0  ;;  %v3874_v17 = vld [vmem:[%s4918_s7 + $0x20] sm:$0xff] }
 0xc45   :  { %v2419_v57 = vmul.f32 %v4316_v3, %v2390_v1  ;;  %v3875_v3 = vld [vmem:[%s4918_s7 + $0x28] sm:$0xff] }
 0xc46   :  { %3537 = vmatmul.mubr.msk.bf16.gmra.mrb[44].mxu1 %vm258_vm2, %v4227_v60  ;;  %2432 = vperm.xlu1 %3758, %v2420_v27  }
 0xc47   :  { %v3557_v6 = vpop.f32.mrb[54].mxu0  ;;  %3540 = vmatprep.mubr.msk.bf16.mxu1 %vm3877_vm0, %v3876_v0 }
 0xc48   :  { %v2400_v10 = vpop.f32.mrb[55].mxu0  ;;  %v2422_v25 = vmul.f32 %v4325_v48, %v3557_v6 }
 0xc49   :  { %v2421_v60 = vmul.f32 %v4323_v36, %v2400_v10  ;;  %v3831_v36 = vld [vmem:[%s4872_s18 + $0x18] sm:$0xff]  }
 0xc4a   :  { %2427 = vperm.xlu1 %3758, %v2419_v57  }
 0xc4e   :  { %3541 = vmatmul.mubr.msk.bf16.gmra.mrb[48].mxu1 %vm258_vm2, %v4245_v63  ;;  %2442 = vperm.xlu1 %3758, %v2422_v25   ;;  %v3830_v63 = vld [vmem:[%s4872_s18 + $0x10] sm:$0xff]  }
 0xc4f   :  { %3558 = vmatprep.mubr.msk.f32.mxu1 %vm258_vm2, %v3874_v17  ;;  %3562 = vmatpush3.bf16.msra.mxu0 %v3830_v63 }
 0xc50   :  { %3563 = vmatprep.subr.bf16.mxu0 %v3876_v0 }
 0xc52   :  { %2437 = vperm.xlu1 %3758, %v2421_v60  }
 0xc53   :  { %3564 = vmatpush3.bf16.msra.mxu0 %v3831_v36 }
 0xc56   :  { %3559 = vmatmul.mubr.msk.f32.vlgmr.msra.gmra.mrb[52].mxu1 %vm258_vm2, %v3875_v3 }
 0xc57   :  { %3597 = vmatprep.mubr.msk.bf16.mxu1 %vm569_vm10, %v4488_v22 }
 0xcc5   :  { %v2433_v48 = vpop.permute.xlu1 %2432 }
 0xcc9   :  { %v2428_v38 = vpop.permute.xlu1 %2427 }
 0xccd   :  { %v2443_v42 = vpop.permute.xlu1 %2442 }
 0xcd1   :  { %v2438_v30 = vpop.permute.xlu1 %2437 }
 0xd11   :  { %v2285_v29 = vpop.f32.mrb[40].mxu1 }
 0xd12   :  { %v3711_v22 = vadd.f32 %v4751_v2, %v2285_v29  ;;  %v3534_v16 = vpop.f32.mrb[41].mxu1 }
 0xd13   :  { %v2288_v5 = vpop.f32.mrb[42].mxu1 }
 0xd14   :  { %v2314_v58 = vmax.f32 %v3711_v22, 0.0  ;;  %v3712_v11 = vadd.f32 %v4751_v2, %v2288_v5  ;;  %v3535_v62 = vpop.f32.mrb[43].mxu1 }
 0xd16   :  { %v2315_v32 = vmax.f32 %v3712_v11, 0.0  ;;  %v2455_v51 = vmul.f32 %v2428_v38, %v2314_v58 }
 0xd18   :  { %v2456_v41 = vmul.f32 %v2433_v48, %v2315_v32 }
 0xd19   :  { %v2293_v43 = vpop.f32.mrb[44].mxu1 }
 0xd1a   :  { %v2461_v14 = vpack.c.bf16 %v2456_v41, %v2455_v51  ;;  %v3713_v15 = vadd.f32 %v4751_v2, %v2293_v43  ;;  %v3538_v18 = vpop.f32.mrb[45].mxu1 }
 0xd1b   :  { %v2296_v46 = vpop.f32.mrb[46].mxu1  ;;  %v2608_v18 = vpack.c.bf16 %v4714_v7, %v4714_v7  ;;  %v3085_v7 = vld [vmem:[%s4878_s13 + $0x1] ss:$0 sm:$0xff] }
 0xd1c   :  { %v2316_v19 = vmax.f32 %v3713_v15, 0.0  ;;  %v3714_v56 = vadd.f32 %v4751_v2, %v2296_v46  ;;  %v3539_v12 = vpop.f32.mrb[47].mxu1  ;;  %3566 = vmatmul.mubr.msk.bf16.vlgmr.msra.gmra.mrb[56].mxu0 %vm258_vm2, %v2461_v14  ;;  %v3832_v14 = vld [vmem:[%s4875_s12 + $0x10] sm:$0xff]   ;;  %v3833_v15 = vld [vmem:[%s4875_s12 + $0x18] sm:$0xff]  }
 0xd1d   :  { %3569 = vmatprep.mubr.msk.bf16.mxu0 %vm3877_vm0, %v3876_v0 }
 0xd1e   :  { %v2317_v21 = vmax.f32 %v3714_v56, 0.0  ;;  %v2457_v28 = vmul.f32 %v2438_v30, %v2316_v19 }
 0xd20   :  { %v2458_v31 = vmul.f32 %v2443_v42, %v2317_v21 }
 0xd21   :  { %v2301_v45 = vpop.f32.mrb[48].mxu1 }
 0xd22   :  { %v2462_v9 = vpack.c.bf16 %v2458_v31, %v2457_v28  ;;  %v3542_v50 = vpop.f32.mrb[49].mxu1  ;;  %v3715_v4 = vadd.f32 %v4751_v2, %v2301_v45 }
 0xd23   :  { %v2304_v53 = vpop.f32.mrb[50].mxu1 }
 0xd24   :  { %v3543_v47 = vpop.f32.mrb[51].mxu1  ;;  %3570 = vmatmul.mubr.msk.bf16.gmra.mrb[60].mxu0 %vm258_vm2, %v2462_v9  ;;  %v3716_v34 = vadd.f32 %v4751_v2, %v2304_v53  ;;  %v2318_v27 = vmax.f32 %v3715_v4, 0.0 }
 0xd25   :  { %3573 = vmatprep.mubr.msk.bf16.mxu0 %vm3877_vm0, %v3876_v0 }
 0xd26   :  { %v2319_v1 = vmax.f32 %v3716_v34, 0.0 }
 0xd29   :  { %v3560_v24 = vpop.f32.mrb[52].mxu1 }
 0xd2a   :  { %v2410_v52 = vpop.f32.mrb[53].mxu1  ;;  %v2424_v35 = vmul.f32 %v4331_v33, %v3560_v24 }
 0xd2b   :  { %v2423_v20 = vmul.f32 %v4329_v49, %v2410_v52  ;;  %v3077_v49 = vld [vmem:[%s4876_s19 + $0x1] ss:$0 sm:$0xff] }
 0xd2d   :  { %2447 = vperm.xlu1 %3758, %v2423_v20  }
 0xd31   :  { %2452 = vperm.xlu1 %3758, %v2424_v35  }
 0xdac   :  { %v2448_v55 = vpop.permute.xlu1 %2447 }
 0xdad   :  { %v2459_v57 = vmul.f32 %v2448_v55, %v2318_v27  ;;  %v31_v55 = vstv %s4883_s25  ;;  %v3834_v27 = vld [vmem:[%s4879_s22 + $0x30] sm:$0xff]  }
 0xdae   :  { %32 = vst [vmem:[#allocation2] sm:$0x1] %v31_v55 }
 0xdb0   :  { %v2453_v6 = vpop.permute.xlu1 %2452 }
 0xdb1   :  { %v2460_v10 = vmul.f32 %v2453_v6, %v2319_v1  ;;  %v3835_v1 = vld [vmem:[%s4879_s22 + $0x38] sm:$0xff]   ;;  %v3837_v6 = vld [vmem:[%s4879_s22 + $0x48] sm:$0xff]  }
 0xdb3   :  { %v2463_v25 = vpack.c.bf16 %v2460_v10, %v2459_v57  ;;  %v3838_v57 = vld [vmem:[%s4879_s22 + $0x50] sm:$0xff]  }
 0xdb5   :  { %3574 = vmatmul.mubr.msk.bf16.gmra.mrb[64].mxu0 %vm258_vm2, %v2463_v25  ;;  %v3839_v25 = vld [vmem:[%s4879_s22 + $0x58] sm:$0xff]  }
 0xdb6   :  { %3583 = vmatprep.mubr.msk.bf16.mxu0 %vm358_vm4, %v4460_v44 }
 0xdef   :  { %v2525_v33 = vpop.f32.mrb[56].mxu0 }
 0xdf0   :  { %v3567_v17 = vpop.f32.mrb[57].mxu0  ;;  %v2526_v3 = vadd.f32 %v3077_v49, %v2525_v33 }
 0xdf1   :  { %v2528_v60 = vpop.f32.mrb[58].mxu0 }
 0xdf2   :  { %v2529_v63 = vadd.f32 %v3077_v49, %v2528_v60  ;;  %v3568_v36 = vpop.f32.mrb[59].mxu0 }
 0xdf4   :  { %v2548_v48 = vpack.c.bf16 %v2529_v63, %v2526_v3  ;;  %v2869_v63 = vld [vmem:[#allocation2] sm:$0x1] }
 0xdf6   :  { %3577 = vmatprep.subr.bf16.mxu0 %v2548_v48 }
 0xdf7   :  { %v2533_v29 = vpop.f32.mrb[60].mxu0  ;;  %3578 = vmatpush3.bf16.msra.mxu0 %v2548_v48 }
 0xdf8   :  { %v3571_v22 = vpop.f32.mrb[61].mxu0  ;;  %v2534_v38 = vadd.f32 %v3077_v49, %v2533_v29 }
 0xdf9   :  { %v2536_v16 = vpop.f32.mrb[62].mxu0 }
 0xdfa   :  { %v2537_v5 = vadd.f32 %v3077_v49, %v2536_v16  ;;  %v3572_v58 = vpop.f32.mrb[63].mxu0 }
 0xdfc   :  { %v2549_v44 = vpack.c.bf16 %v2537_v5, %v2534_v38 }
 0xdfe   :  { %3579 = vmatprep.subr.bf16.mxu0 %v2549_v44 }
 0xdff   :  { %3580 = vmatpush3.bf16.msra.mxu0 %v2549_v44 }
 0xe88   :  { %v2541_v11 = vpop.f32.mrb[64].mxu0 }
 0xe89   :  { %v3575_v62 = vpop.f32.mrb[65].mxu0  ;;  %v2542_v51 = vadd.f32 %v3077_v49, %v2541_v11 }
 0xe8a   :  { %v2544_v32 = vpop.f32.mrb[66].mxu0 }
 0xe8b   :  { %v2545_v41 = vadd.f32 %v3077_v49, %v2544_v32  ;;  %v3576_v42 = vpop.f32.mrb[67].mxu0 }
 0xe8d   :  { %v2550_v43 = vpack.c.bf16 %v2545_v41, %v2542_v51 }
 0xe8f   :  { %3581 = vmatprep.subr.bf16.mxu0 %v2550_v43 }
 0xe90   :  { %3582 = vmatpush3.bf16.msra.mxu0 %v2550_v43 }
 0xe91   :  { %3587 = vmatprep.subr.bf16.mxu0 %v3876_v0 }
 0xe93   :  { %3584 = vmatmul.mubr.msk.bf16.vlgmr.msra.gmra.mrb[48].mxu0 %vm358_vm4, %v4498_v61 }
 0xe94   :  { %3588 = vmatpush3.bf16.msra.mxu0 %v3832_v14  ;;  %3591 = vmatprep.mubr.msk.bf16.mxu0 %vm3877_vm0, %v3876_v0 }
 0xe95   :  { %3589 = vmatprep.subr.bf16.mxu0 %v3876_v0 }
 0xe98   :  { %3590 = vmatpush3.bf16.msra.mxu0 %v3833_v15 }
 0xe99   :  { %3601 = vmatprep.subr.bf16.mxu0 %v3834_v27 }
 0xe9b   :  { %3592 = vmatmul.mubr.msk.bf16.vlgmr.msra.gmra.mrb[68].mxu0 %vm258_vm2, %v2608_v18  ;;  %v3091_v18 = vld [vmem:[%s4881_s23 + $0x1] ss:$0 sm:$0xff] }
 0xe9c   :  { %3602 = vmatpush3.bf16.msra.mxu0 %v3834_v27 }
 0xe9d   :  { %3603 = vmatprep.subr.bf16.mxu0 %v3835_v1 }
 0xea0   :  { %3604 = vmatpush3.bf16.msra.mxu0 %v3835_v1 }
 0xf66   :  { %v3585_v46 = vpop.f32.mrb[48].mxu0 }
 0xf67   :  { %v3707_v19 = vadd.f32 %v3585_v46, %v4751_v2  ;;  %v2585_v61 = vpop.f32.mrb[49].mxu0 }
 0xf68   :  { %v3708_v56 = vadd.f32 %v4751_v2, %v2585_v61  ;;  %v3586_v12 = vpop.f32.mrb[50].mxu0 }
 0xf69   :  { %v3709_v21 = vadd.f32 %v3586_v12, %v4751_v2  ;;  %v2588_v30 = vpop.f32.mrb[51].mxu0  ;;  %v2606_v31 = vmax.f32 %v3707_v19, 0.0 }
 0xf6a   :  { %v3710_v28 = vadd.f32 %v4751_v2, %v2588_v30  ;;  %v2604_v9 = vmax.f32 %v3708_v56, 0.0 }
 0xf6b   :  { %v2607_v45 = vmax.f32 %v3709_v21, 0.0 }
 0xf6c   :  { %v2605_v50 = vmax.f32 %v3710_v28, 0.0 }
 0xf6d   :  { %v3794_v53 = vpack.i.bf16 %v2607_v45, %v2606_v31 }
 0xf6e   :  { %v3779_v47 = vpack.i.bf16 %v2605_v50, %v2604_v9  ;;  %v2664_v24 = vpop.f32.mrb[68].mxu0 }
 0xf6f   :  { %v2665_v52 = vadd.f32 %v3085_v7, %v2664_v24  ;;  %v3593_v20 = vpop.f32.mrb[69].mxu0  ;;  %v2866_v7 = vld [vmem:[%s4884_s24] sm:$0x1] }
 0xf70   :  { %v2667_v35 = vpop.f32.mrb[70].mxu0  ;;  %3780 = vrot.lane.b32.xlu1 %v3779_v47, %s3879_s28 }
 0xf71   :  { %v2670_v4 = vpack.c.bf16 %v2665_v52, %v2665_v52  ;;  %v3594_v34 = vpop.f32.mrb[71].mxu0 }
 0xf73   :  { %v2672_v2 = vsel %vm1590_vm13, %v2670_v4, 0  ;;  %3750 = vmatprep.subr.msk.bf16.mxu1 %vm1590_vm13, %v2670_v4 }
 0xf74   :  { %3596 = vmatpush3.bf16.msra.mxu1 %v2672_v2 }
 0xf75   :  { %3617 = vmatprep.subr.bf16.mxu1 %v3876_v0 }
 0xf77   :  { %3598 = vmatmul.mubr.msk.bf16.vlgmr.msra.gmra.mrb[56].mxu1 %vm569_vm10, %v4538_v37  ;;  %v3836_v37 = vld [vmem:[%s4879_s22 + $0x40] sm:$0xff]  }
 0xf78   :  { %3621 = vmatprep.mubr.msk.bf16.mxu1 %vm3877_vm0, %v3876_v0  ;;  %3605 = vmatprep.subr.bf16.mxu0 %v3836_v37 }
 0xf79   :  { %3606 = vmatpush3.bf16.msra.mxu0 %v3836_v37 }
 0xf7a   :  { %3607 = vmatprep.subr.bf16.mxu0 %v3837_v6 }
 0xf7d   :  { %3608 = vmatpush3.bf16.msra.mxu0 %v3837_v6 }
 0xf7e   :  { %3609 = vmatprep.subr.bf16.mxu0 %v3838_v57 }
 0xf81   :  { %3610 = vmatpush3.bf16.msra.mxu0 %v3838_v57 }
 0xf82   :  { %3611 = vmatprep.subr.bf16.mxu0 %v3839_v25 }
 0xf85   :  { %3612 = vmatpush3.bf16.msra.mxu0 %v3839_v25 }
 0xfe2   :  { %v3781_v36 = vpop.permute.xlu1 %3780 }
 0xfe3   :  { %v3783_v38 = vunpack.i.h.bf16 %v3781_v36  ;;  %v3782_v5 = vunpack.i.l.bf16 %v3781_v36 }
0x104a   :  { %v3599_v10 = vpop.f32.mrb[56].mxu1 }
0x104b   :  { %v2708_v49 = vpop.f32.mrb[57].mxu1 }
0x104c   :  { %v3600_v33 = vpop.f32.mrb[58].mxu1 }
0x104d   :  { %v3784_v17 = vpack.i.bf16 %v3600_v33, %v3599_v10  ;;  %v2711_v60 = vpop.f32.mrb[59].mxu1 }
0x104e   :  { %v3789_v3 = vpack.i.bf16 %v2711_v60, %v2708_v49 }
0x104f   :  { %3785 = vrot.lane.b32.xlu1 %v3784_v17, %s3880_s17 }
0x1053   :  { %3790 = vrot.lane.b32.xlu1 %v3789_v3, %s3880_s17 }
0x1057   :  { %3795 = vrot.lane.b32.xlu1 %v3794_v53, %s3879_s28  ;;  %v2875_v53 = vlaneseq }
0x1059   :  { %v2876_v47 = vshrl.u32 %v2875_v53, 7 }
0x105b   :  { %2872 = vperm.xlu1 %3758, %v2869_v63   ;;  %v2877_v24 = vsub.s32 0, %v2876_v47 }
0x10c1   :  { %v3786_v48 = vpop.permute.xlu1 %3785 }
0x10c2   :  { %v3788_v58 = vunpack.i.h.bf16 %v3786_v48  ;;  %v3787_v44 = vunpack.i.l.bf16 %v3786_v48 }
0x10c4   :  { %v2758_v15 = vsel %vm258_vm2, %v1786_v8, %v3788_v58  ;;  %v2757_v39 = vsel %vm258_vm2, %v1785_v40, %v3787_v44 }
0x10c5   :  { %v3791_v29 = vpop.permute.xlu1 %3790 }
0x10c6   :  { %v3793_v22 = vunpack.i.h.bf16 %v3791_v29  ;;  %v3792_v16 = vunpack.i.l.bf16 %v3791_v29 }
0x10c8   :  { %v2756_v11 = vsel %vm258_vm2, %v1784_v59, %v3793_v22  ;;  %v2755_v62 = vsel %vm258_vm2, %v1783_v13, %v3792_v16 }
0x10c9   :  { %v3796_v32 = vpop.permute.xlu1 %3795  ;;  %v2759_v51 = vsel %vm182_vm1, %v2755_v62, %v3782_v5  ;;  %v2760_v41 = vsel %vm182_vm1, %v2756_v11, %v3783_v38 }
0x10ca   :  { %v3798_v42 = vunpack.i.h.bf16 %v3796_v32  ;;  %v3797_v43 = vunpack.i.l.bf16 %v3796_v32  ;;  %v2763_v14 = vpack.c.bf16 %v2760_v41, %v2759_v51 }
0x10cc   :  { %v2761_v23 = vsel %vm182_vm1, %v2757_v39, %v3797_v43  ;;  %v2762_v13 = vsel %vm182_vm1, %v2758_v15, %v3798_v42  ;;  %3613 = vmatprep.mubr.msk.bf16.mxu0 %vm1727_vm14, %v2763_v14 }
0x10cd   :  { %v2764_v59 = vpack.c.bf16 %v2762_v13, %v2761_v23 }
0x10cf   :  { %3614 = vmatmul.mubr.msk.bf16.vlgmr.msra.gmra.mrb[72].mxu0 %vm1727_vm14, %v2764_v59 }
0x10da   :  { %v2873_v52 = vpop.permute.xlu1 %2872 }
0x10db   :  { %v2878_v20 = vrot.slane %v2873_v52, %v2877_v24 }
0x11a2   :  { %v3615_v26 = vpop.f32.mrb[72].mxu0 }
0x11a3   :  { %v2856_v46 = vadd.f32 %v3615_v26, %v3091_v18  ;;  %v2847_v8 = vpop.f32.mrb[73].mxu0 }
0x11a4   :  { %v2848_v19 = vadd.f32 %v3091_v18, %v2847_v8  ;;  %v3616_v54 = vpop.f32.mrb[74].mxu0 }
0x11a5   :  { %v2859_v61 = vadd.f32 %v3616_v54, %v3091_v18  ;;  %v2850_v40 = vpop.f32.mrb[75].mxu0  ;;  %v2864_v12 = vmax.f32 %v2856_v46, 0.0 }
0x11a6   :  { %v2851_v56 = vadd.f32 %v3091_v18, %v2850_v40  ;;  %v2862_v30 = vmax.f32 %v2848_v19, 0.0 }
0x11a7   :  { %v2865_v21 = vmax.f32 %v2859_v61, 0.0 }
0x11a8   :  { %v2863_v28 = vmax.f32 %v2851_v56, 0.0 }
0x11a9   :  { %v2868_v31 = vpack.c.bf16 %v2865_v21, %v2864_v12 }
0x11aa   :  { %v2867_v45 = vpack.c.bf16 %v2863_v28, %v2862_v30 }
0x11ab   :  { %v2886_v50 = vsel %vm258_vm2, %v2868_v31, 0 }
0x11ac   :  { %v2883_v9 = vsel %vm258_vm2, %v2867_v45, 0 }
0x11ad   :  { %3618 = vmatpush3.bf16.xpose.msra.mxu1 %v2883_v9 }
0x11ae   :  { %3619 = vmatprep.subr.bf16.mxu1 %v3876_v0 }
0x11b5   :  { %3620 = vmatpush3.bf16.xpose.msra.mxu1 %v2886_v50 }
0x11bc   :  { %3622 = vmatmul.mubr.msk.bf16.vlgmr.msra.gmra.mrb[60].mxu1 %vm258_vm2, %v2866_v7 }
0x128f   :  { %v2922_v35 = vpop.f32.mrb[60].mxu1 }
0x1290   :  { %v2923_v4 = vadd.f32 %v2922_v35, %v2878_v20  ;;  %v3623_v34 = vpop.f32.mrb[61].mxu1 }
0x1291   :  { %v2925_v2 = vpop.f32.mrb[62].mxu1 }
0x1292   :  { %v2928_v0 = vsel %vm258_vm2, %v2923_v4, 0.0  ;;  %v3624_v55 = vpop.f32.mrb[63].mxu1 }
0x1293   :  { %2929 = vst [vmem:[%s4885_s26] sm:$0x1] %v2928_v0 }

</bundles_post_ra>
